<compile_context>
chip_gen: v7x
topology: tpu7x:2x2x1
jax: 0.10.0
libtpu: 0.0.40
codegen_flags: <defaults>
</compile_context>

<pallas_src>
import functools

import jax
import jax.numpy as jnp
from jax import lax
from jax.experimental import pallas as pl
from jax.experimental.pallas import tpu as pltpu

BLOCK_SIZE = 256                      # tril buffer size in the PyTorch module
EMB_SIZE = 384
NUM_HEADS = 6
HEAD_SIZE = EMB_SIZE // NUM_HEADS     # 64
DROPOUT_P = 0.2                       # unused at inference


def _mha_kernel(x_ref, wq_ref, wk_ref, wv_ref, o_ref, *, num_heads, head_size):
    # x_ref: (T, E) bf16
    # wq/wk/wv_ref: (E, H*D) bf16 (scale already folded into Wq)
    # o_ref: (T, H*D) f32
    x = x_ref[...]

    # Fused Q/K/V projections: full-width MXU matmuls, f32 accumulation.
    q = jnp.dot(x, wq_ref[...], preferred_element_type=jnp.float32)   # (T, HD)
    k = jnp.dot(x, wk_ref[...], preferred_element_type=jnp.float32)   # (T, HD)
    v = jnp.dot(x, wv_ref[...], preferred_element_type=jnp.float32)   # (T, HD)

    # Causal mask built from iota (no tril buffer traffic).
    T = x.shape[0]
    row = lax.broadcasted_iota(jnp.int32, (T, T), 0)
    col = lax.broadcasted_iota(jnp.int32, (T, T), 1)
    causal = col <= row

    # Per-head scores / softmax / AV, statically unrolled over heads.
    outs = []
    for h in range(num_heads):
        sl = slice(h * head_size, (h + 1) * head_size)
        q_h = q[:, sl].astype(jnp.bfloat16)                           # (T, D)
        k_h = k[:, sl].astype(jnp.bfloat16)                           # (T, D)
        v_h = v[:, sl].astype(jnp.bfloat16)                           # (T, D)

        # Scale is pre-folded into Wq, so no * scale here.
        s = jnp.einsum("td,sd->ts", q_h, k_h,
                       preferred_element_type=jnp.float32)            # (T, T)
        s = jnp.where(causal, s, -jnp.inf)

        # Numerically-stable softmax; normalization deferred past the AV
        # matmul (row-wise scale commutes with the matmul), so only a (T, D)
        # multiply instead of a (T, T) one.
        m = jnp.max(s, axis=-1, keepdims=True)
        p = jnp.exp(s - m)
        l = jnp.sum(p, axis=-1, keepdims=True)
        # TODO(synk): dropout(p=0.2) on attention probs skipped (eval mode).
        out_h = jnp.dot(p.astype(jnp.bfloat16), v_h,
                        preferred_element_type=jnp.float32)            # (T, D)
        outs.append(out_h * pl.reciprocal(l, approx=True))

    # One lane-dense (T, H*D) store — already in the final concat layout.
    o_ref[...] = jnp.concatenate(outs, axis=-1).astype(o_ref.dtype)


def prepare_params(wq, wk, wv):
    """Pack (H, E, D) weights to (E, H*D), fold the attention scale into Wq,
    and cast to bf16 ONCE (cache the result across calls)."""
    H, E, D = wq.shape
    # NOTE: the PyTorch module scales by C**-0.5 with C = emb_size (384),
    # NOT head_size — keep that exact behavior; do not "fix" it.
    scale = float(E) ** -0.5

    def pack(w):
        return jnp.transpose(w, (1, 0, 2)).reshape(E, H * D)

    wq_p = pack(wq * scale).astype(jnp.bfloat16)
    wk_p = pack(wk).astype(jnp.bfloat16)
    wv_p = pack(wv).astype(jnp.bfloat16)
    return wq_p, wk_p, wv_p


def multi_head_attention(x, wq_p, wk_p, wv_p, *, num_heads=NUM_HEADS):
    """x: (B, T, E) f32.  wq_p/wk_p/wv_p: (E, H*D) bf16 from prepare_params.
    Returns (B, T, H*D) f32 — concat of heads along the feature dim."""
    B, T, E = x.shape
    HD = wq_p.shape[1]
    D = HD // num_heads
    assert T <= BLOCK_SIZE and wq_p.shape[0] == E

    xb = x.astype(jnp.bfloat16)

    out = pl.pallas_call(
        functools.partial(_mha_kernel, num_heads=num_heads, head_size=D),
        out_shape=jax.ShapeDtypeStruct((B, T, HD), jnp.float32),
        grid_spec=pltpu.PrefetchScalarGridSpec(
            num_scalar_prefetch=0,
            grid=(B,),
            in_specs=[
                pl.BlockSpec((None, T, E), lambda b: (b, 0, 0)),   # x[b]
                pl.BlockSpec((E, HD), lambda b: (0, 0)),           # Wq packed
                pl.BlockSpec((E, HD), lambda b: (0, 0)),           # Wk packed
                pl.BlockSpec((E, HD), lambda b: (0, 0)),           # Wv packed
            ],
            out_specs=pl.BlockSpec((None, T, HD), lambda b: (b, 0, 0)),
        ),
        compiler_params=pltpu.CompilerParams(
            dimension_semantics=("parallel",),
            vmem_limit_bytes=32 << 20,
        ),
    )(xb, wq_p, wk_p, wv_p)
    # TODO(synk): dropout(p=0.2) on the concatenated output skipped (eval mode).
    return out


def init_params(key, emb_size=EMB_SIZE, num_heads=NUM_HEADS,
                head_size=HEAD_SIZE):
    """nn.Linear(emb, head, bias=False) init: U(-1/sqrt(emb), 1/sqrt(emb)).

    Stored as (num_heads, emb, head) so x @ W matches the PyTorch Linear.
    """
    kq, kk, kv = jax.random.split(key, 3)
    bound = 1.0 / jnp.sqrt(emb_size)
    shape = (num_heads, emb_size, head_size)
    wq = jax.random.uniform(kq, shape, jnp.float32, -bound, bound)
    wk = jax.random.uniform(kk, shape, jnp.float32, -bound, bound)
    wv = jax.random.uniform(kv, shape, jnp.float32, -bound, bound)
    return wq, wk, wv


def _reference(x, wq, wk, wv):
    """Plain-JAX f32 reference of the eval-mode PyTorch module."""
    B, T, E = x.shape
    H, _, D = wq.shape
    scale = float(E) ** -0.5
    q = jnp.einsum("bte,hed->bhtd", x, wq)
    k = jnp.einsum("bte,hed->bhtd", x, wk)
    v = jnp.einsum("bte,hed->bhtd", x, wv)
    s = jnp.einsum("bhtd,bhsd->bhts", q, k) * scale
    mask = jnp.tril(jnp.ones((T, T), dtype=bool))
    s = jnp.where(mask[None, None], s, -jnp.inf)
    wei = jax.nn.softmax(s, axis=-1)
    out = jnp.einsum("bhts,bhsd->bhtd", wei, v)
    return out.transpose(0, 2, 1, 3).reshape(B, T, H * D)


if __name__ == "__main__":
    key = jax.random.PRNGKey(0)
    k_x, k_p = jax.random.split(key)

    batch, seq = 2, 8
    x = jax.random.normal(k_x, (batch, seq, EMB_SIZE), jnp.float32)
    wq, wk, wv = init_params(k_p)

    # Pack / scale-fold / bf16-cast weights once (cached across calls).
    wq_p, wk_p, wv_p = prepare_params(wq, wk, wv)

    out = multi_head_attention(x, wq_p, wk_p, wv_p)
    out = jax.block_until_ready(out)

    ref = _reference(x, wq, wk, wv)
    assert out.shape == (batch, seq, NUM_HEADS * HEAD_SIZE)
    # bf16 matmul operands + approx reciprocal vs f32 reference -> loose tol.
    assert jnp.allclose(out, ref, atol=3e-2, rtol=3e-2), (
        float(jnp.max(jnp.abs(out - ref))))

    print("KERNEL_OK")
</pallas_src>

<mosaic_0001>
module attributes {stable_mosaic.version = 11 : i64} {
  func.func @_mha_kernel(%arg0: i32, %arg1: memref<1x8x384xbf16, #tpu.memory_space<vmem>>, %arg2: memref<384x384xbf16, #tpu.memory_space<vmem>>, %arg3: memref<384x384xbf16, #tpu.memory_space<vmem>>, %arg4: memref<384x384xbf16, #tpu.memory_space<vmem>>, %arg5: memref<1x8x384xf32, #tpu.memory_space<vmem>>) attributes {dimension_semantics = [#tpu.dimension_semantics<parallel>], iteration_bounds = array<i64: 2>, scalar_prefetch = 0 : i64, scratch_operands = 0 : i64, tpu.core_type = #tpu.core_type<tc>, window_params = [{transform_indices = @transform_0, window_bounds = array<i64: 1, 8, 384>}, {pipeline_mode = #tpu.pipeline_mode<synchronous>, transform_indices = @transform_1, window_bounds = array<i64: 384, 384>}, {pipeline_mode = #tpu.pipeline_mode<synchronous>, transform_indices = @transform_2, window_bounds = array<i64: 384, 384>}, {pipeline_mode = #tpu.pipeline_mode<synchronous>, transform_indices = @transform_3, window_bounds = array<i64: 384, 384>}, {transform_indices = @transform_4, window_bounds = array<i64: 1, 8, 384>}]} {
    %c0 = arith.constant 0 : index
    %c0_0 = arith.constant 0 : index
    %c0_1 = arith.constant 0 : index
    %0 = vector.load %arg1[%c0, %c0_0, %c0_1] : memref<1x8x384xbf16, #tpu.memory_space<vmem>>, vector<1x8x384xbf16>
    %1 = vector.shape_cast %0 : vector<1x8x384xbf16> to vector<8x384xbf16>
    %c0_2 = arith.constant 0 : index
    %c0_3 = arith.constant 0 : index
    %2 = vector.load %arg2[%c0_2, %c0_3] : memref<384x384xbf16, #tpu.memory_space<vmem>>, vector<384x384xbf16>
    %cst = arith.constant dense<0.000000e+00> : vector<8x384xf32>
    %3 = tpu.matmul %1, %2, %cst {dimension_numbers = #tpu.dot_dimension_numbers<[1], [0], [0], [1], [0, 0, 1, 1], [], []>} : vector<8x384xbf16>, vector<384x384xbf16>, vector<8x384xf32> -> vector<8x384xf32>
    %c0_4 = arith.constant 0 : index
    %c0_5 = arith.constant 0 : index
    %4 = vector.load %arg3[%c0_4, %c0_5] : memref<384x384xbf16, #tpu.memory_space<vmem>>, vector<384x384xbf16>
    %cst_6 = arith.constant dense<0.000000e+00> : vector<8x384xf32>
    %5 = tpu.matmul %1, %4, %cst_6 {dimension_numbers = #tpu.dot_dimension_numbers<[1], [0], [0], [1], [0, 0, 1, 1], [], []>} : vector<8x384xbf16>, vector<384x384xbf16>, vector<8x384xf32> -> vector<8x384xf32>
    %c0_7 = arith.constant 0 : index
    %c0_8 = arith.constant 0 : index
    %6 = vector.load %arg4[%c0_7, %c0_8] : memref<384x384xbf16, #tpu.memory_space<vmem>>, vector<384x384xbf16>
    %cst_9 = arith.constant dense<0.000000e+00> : vector<8x384xf32>
    %7 = tpu.matmul %1, %6, %cst_9 {dimension_numbers = #tpu.dot_dimension_numbers<[1], [0], [0], [1], [0, 0, 1, 1], [], []>} : vector<8x384xbf16>, vector<384x384xbf16>, vector<8x384xf32> -> vector<8x384xf32>
    %8 = tpu.iota {dimensions = array<i32: 0>} : vector<8x8xi32>
    %9 = tpu.iota {dimensions = array<i32: 1>} : vector<8x8xi32>
    %10 = arith.cmpi sle, %9, %8 : vector<8x8xi32>
    %11 = vector.extract_strided_slice %3 {offsets = [0, 0], sizes = [8, 64], strides = [1, 1]} : vector<8x384xf32> to vector<8x64xf32>
    %12 = arith.truncf %11 : vector<8x64xf32> to vector<8x64xbf16>
    %13 = vector.extract_strided_slice %5 {offsets = [0, 0], sizes = [8, 64], strides = [1, 1]} : vector<8x384xf32> to vector<8x64xf32>
    %14 = arith.truncf %13 : vector<8x64xf32> to vector<8x64xbf16>
    %15 = vector.extract_strided_slice %7 {offsets = [0, 0], sizes = [8, 64], strides = [1, 1]} : vector<8x384xf32> to vector<8x64xf32>
    %16 = arith.truncf %15 : vector<8x64xf32> to vector<8x64xbf16>
    "tpu.trace_start"() <{level = 10 : i32, message = "td,sd->ts"}> : () -> ()
    %cst_10 = arith.constant dense<0.000000e+00> : vector<8x8xf32>
    %17 = tpu.matmul %12, %14, %cst_10 {dimension_numbers = #tpu.dot_dimension_numbers<[1], [1], [0], [0], [0, 0, 1, 0], [], []>} : vector<8x64xbf16>, vector<8x64xbf16>, vector<8x8xf32> -> vector<8x8xf32>
    %cst_11 = arith.constant 0xFF800000 : f32
    "tpu.trace_stop"() : () -> ()
    %18 = vector.broadcast %cst_11 : f32 to vector<8x8xf32>
    %19 = arith.select %10, %17, %18 : vector<8x8xi1>, vector<8x8xf32>
    %cst_12 = arith.constant dense<0xFF800000> : vector<8xf32>
    %20 = vector.multi_reduction <maximumf>, %19, %cst_12 [1] : vector<8x8xf32> to vector<8xf32>
    %21 = vector.shape_cast %20 : vector<8xf32> to vector<8x1xf32>
    %22 = vector.broadcast %21 : vector<8x1xf32> to vector<8x8xf32>
    %23 = arith.subf %19, %22 : vector<8x8xf32>
    %24 = math.exp %23 : vector<8x8xf32>
    %cst_13 = arith.constant dense<0.000000e+00> : vector<8xf32>
    %25 = vector.multi_reduction <add>, %24, %cst_13 [1] : vector<8x8xf32> to vector<8xf32>
    %26 = vector.shape_cast %25 : vector<8xf32> to vector<8x1xf32>
    %27 = arith.truncf %24 : vector<8x8xf32> to vector<8x8xbf16>
    %cst_14 = arith.constant dense<0.000000e+00> : vector<8x64xf32>
    %28 = tpu.matmul %27, %16, %cst_14 {dimension_numbers = #tpu.dot_dimension_numbers<[1], [0], [0], [1], [0, 0, 1, 1], [], []>} : vector<8x8xbf16>, vector<8x64xbf16>, vector<8x64xf32> -> vector<8x64xf32>
    %29 = tpu.reciprocal %26 {approx = true} : vector<8x1xf32> -> vector<8x1xf32>
    %30 = vector.broadcast %29 : vector<8x1xf32> to vector<8x64xf32>
    %31 = arith.mulf %28, %30 : vector<8x64xf32>
    %32 = vector.extract_strided_slice %3 {offsets = [0, 64], sizes = [8, 64], strides = [1, 1]} : vector<8x384xf32> to vector<8x64xf32>
    %33 = arith.truncf %32 : vector<8x64xf32> to vector<8x64xbf16>
    %34 = vector.extract_strided_slice %5 {offsets = [0, 64], sizes = [8, 64], strides = [1, 1]} : vector<8x384xf32> to vector<8x64xf32>
    %35 = arith.truncf %34 : vector<8x64xf32> to vector<8x64xbf16>
    %36 = vector.extract_strided_slice %7 {offsets = [0, 64], sizes = [8, 64], strides = [1, 1]} : vector<8x384xf32> to vector<8x64xf32>
    %37 = arith.truncf %36 : vector<8x64xf32> to vector<8x64xbf16>
    "tpu.trace_start"() <{level = 10 : i32, message = "td,sd->ts"}> : () -> ()
    %cst_15 = arith.constant dense<0.000000e+00> : vector<8x8xf32>
    %38 = tpu.matmul %33, %35, %cst_15 {dimension_numbers = #tpu.dot_dimension_numbers<[1], [1], [0], [0], [0, 0, 1, 0], [], []>} : vector<8x64xbf16>, vector<8x64xbf16>, vector<8x8xf32> -> vector<8x8xf32>
    %cst_16 = arith.constant 0xFF800000 : f32
    "tpu.trace_stop"() : () -> ()
    %39 = vector.broadcast %cst_16 : f32 to vector<8x8xf32>
    %40 = arith.select %10, %38, %39 : vector<8x8xi1>, vector<8x8xf32>
    %cst_17 = arith.constant dense<0xFF800000> : vector<8xf32>
    %41 = vector.multi_reduction <maximumf>, %40, %cst_17 [1] : vector<8x8xf32> to vector<8xf32>
    %42 = vector.shape_cast %41 : vector<8xf32> to vector<8x1xf32>
    %43 = vector.broadcast %42 : vector<8x1xf32> to vector<8x8xf32>
    %44 = arith.subf %40, %43 : vector<8x8xf32>
    %45 = math.exp %44 : vector<8x8xf32>
    %cst_18 = arith.constant dense<0.000000e+00> : vector<8xf32>
    %46 = vector.multi_reduction <add>, %45, %cst_18 [1] : vector<8x8xf32> to vector<8xf32>
    %47 = vector.shape_cast %46 : vector<8xf32> to vector<8x1xf32>
    %48 = arith.truncf %45 : vector<8x8xf32> to vector<8x8xbf16>
    %cst_19 = arith.constant dense<0.000000e+00> : vector<8x64xf32>
    %49 = tpu.matmul %48, %37, %cst_19 {dimension_numbers = #tpu.dot_dimension_numbers<[1], [0], [0], [1], [0, 0, 1, 1], [], []>} : vector<8x8xbf16>, vector<8x64xbf16>, vector<8x64xf32> -> vector<8x64xf32>
    %50 = tpu.reciprocal %47 {approx = true} : vector<8x1xf32> -> vector<8x1xf32>
    %51 = vector.broadcast %50 : vector<8x1xf32> to vector<8x64xf32>
    %52 = arith.mulf %49, %51 : vector<8x64xf32>
    %53 = vector.extract_strided_slice %3 {offsets = [0, 128], sizes = [8, 64], strides = [1, 1]} : vector<8x384xf32> to vector<8x64xf32>
    %54 = arith.truncf %53 : vector<8x64xf32> to vector<8x64xbf16>
    %55 = vector.extract_strided_slice %5 {offsets = [0, 128], sizes = [8, 64], strides = [1, 1]} : vector<8x384xf32> to vector<8x64xf32>
    %56 = arith.truncf %55 : vector<8x64xf32> to vector<8x64xbf16>
    %57 = vector.extract_strided_slice %7 {offsets = [0, 128], sizes = [8, 64], strides = [1, 1]} : vector<8x384xf32> to vector<8x64xf32>
    %58 = arith.truncf %57 : vector<8x64xf32> to vector<8x64xbf16>
    "tpu.trace_start"() <{level = 10 : i32, message = "td,sd->ts"}> : () -> ()
    %cst_20 = arith.constant dense<0.000000e+00> : vector<8x8xf32>
    %59 = tpu.matmul %54, %56, %cst_20 {dimension_numbers = #tpu.dot_dimension_numbers<[1], [1], [0], [0], [0, 0, 1, 0], [], []>} : vector<8x64xbf16>, vector<8x64xbf16>, vector<8x8xf32> -> vector<8x8xf32>
    %cst_21 = arith.constant 0xFF800000 : f32
    "tpu.trace_stop"() : () -> ()
    %60 = vector.broadcast %cst_21 : f32 to vector<8x8xf32>
    %61 = arith.select %10, %59, %60 : vector<8x8xi1>, vector<8x8xf32>
    %cst_22 = arith.constant dense<0xFF800000> : vector<8xf32>
    %62 = vector.multi_reduction <maximumf>, %61, %cst_22 [1] : vector<8x8xf32> to vector<8xf32>
    %63 = vector.shape_cast %62 : vector<8xf32> to vector<8x1xf32>
    %64 = vector.broadcast %63 : vector<8x1xf32> to vector<8x8xf32>
    %65 = arith.subf %61, %64 : vector<8x8xf32>
    %66 = math.exp %65 : vector<8x8xf32>
    %cst_23 = arith.constant dense<0.000000e+00> : vector<8xf32>
    %67 = vector.multi_reduction <add>, %66, %cst_23 [1] : vector<8x8xf32> to vector<8xf32>
    %68 = vector.shape_cast %67 : vector<8xf32> to vector<8x1xf32>
    %69 = arith.truncf %66 : vector<8x8xf32> to vector<8x8xbf16>
    %cst_24 = arith.constant dense<0.000000e+00> : vector<8x64xf32>
    %70 = tpu.matmul %69, %58, %cst_24 {dimension_numbers = #tpu.dot_dimension_numbers<[1], [0], [0], [1], [0, 0, 1, 1], [], []>} : vector<8x8xbf16>, vector<8x64xbf16>, vector<8x64xf32> -> vector<8x64xf32>
    %71 = tpu.reciprocal %68 {approx = true} : vector<8x1xf32> -> vector<8x1xf32>
    %72 = vector.broadcast %71 : vector<8x1xf32> to vector<8x64xf32>
    %73 = arith.mulf %70, %72 : vector<8x64xf32>
    %74 = vector.extract_strided_slice %3 {offsets = [0, 192], sizes = [8, 64], strides = [1, 1]} : vector<8x384xf32> to vector<8x64xf32>
    %75 = arith.truncf %74 : vector<8x64xf32> to vector<8x64xbf16>
    %76 = vector.extract_strided_slice %5 {offsets = [0, 192], sizes = [8, 64], strides = [1, 1]} : vector<8x384xf32> to vector<8x64xf32>
    %77 = arith.truncf %76 : vector<8x64xf32> to vector<8x64xbf16>
    %78 = vector.extract_strided_slice %7 {offsets = [0, 192], sizes = [8, 64], strides = [1, 1]} : vector<8x384xf32> to vector<8x64xf32>
    %79 = arith.truncf %78 : vector<8x64xf32> to vector<8x64xbf16>
    "tpu.trace_start"() <{level = 10 : i32, message = "td,sd->ts"}> : () -> ()
    %cst_25 = arith.constant dense<0.000000e+00> : vector<8x8xf32>
    %80 = tpu.matmul %75, %77, %cst_25 {dimension_numbers = #tpu.dot_dimension_numbers<[1], [1], [0], [0], [0, 0, 1, 0], [], []>} : vector<8x64xbf16>, vector<8x64xbf16>, vector<8x8xf32> -> vector<8x8xf32>
    %cst_26 = arith.constant 0xFF800000 : f32
    "tpu.trace_stop"() : () -> ()
    %81 = vector.broadcast %cst_26 : f32 to vector<8x8xf32>
    %82 = arith.select %10, %80, %81 : vector<8x8xi1>, vector<8x8xf32>
    %cst_27 = arith.constant dense<0xFF800000> : vector<8xf32>
    %83 = vector.multi_reduction <maximumf>, %82, %cst_27 [1] : vector<8x8xf32> to vector<8xf32>
    %84 = vector.shape_cast %83 : vector<8xf32> to vector<8x1xf32>
    %85 = vector.broadcast %84 : vector<8x1xf32> to vector<8x8xf32>
    %86 = arith.subf %82, %85 : vector<8x8xf32>
    %87 = math.exp %86 : vector<8x8xf32>
    %cst_28 = arith.constant dense<0.000000e+00> : vector<8xf32>
    %88 = vector.multi_reduction <add>, %87, %cst_28 [1] : vector<8x8xf32> to vector<8xf32>
    %89 = vector.shape_cast %88 : vector<8xf32> to vector<8x1xf32>
    %90 = arith.truncf %87 : vector<8x8xf32> to vector<8x8xbf16>
    %cst_29 = arith.constant dense<0.000000e+00> : vector<8x64xf32>
    %91 = tpu.matmul %90, %79, %cst_29 {dimension_numbers = #tpu.dot_dimension_numbers<[1], [0], [0], [1], [0, 0, 1, 1], [], []>} : vector<8x8xbf16>, vector<8x64xbf16>, vector<8x64xf32> -> vector<8x64xf32>
    %92 = tpu.reciprocal %89 {approx = true} : vector<8x1xf32> -> vector<8x1xf32>
    %93 = vector.broadcast %92 : vector<8x1xf32> to vector<8x64xf32>
    %94 = arith.mulf %91, %93 : vector<8x64xf32>
    %95 = vector.extract_strided_slice %3 {offsets = [0, 256], sizes = [8, 64], strides = [1, 1]} : vector<8x384xf32> to vector<8x64xf32>
    %96 = arith.truncf %95 : vector<8x64xf32> to vector<8x64xbf16>
    %97 = vector.extract_strided_slice %5 {offsets = [0, 256], sizes = [8, 64], strides = [1, 1]} : vector<8x384xf32> to vector<8x64xf32>
    %98 = arith.truncf %97 : vector<8x64xf32> to vector<8x64xbf16>
    %99 = vector.extract_strided_slice %7 {offsets = [0, 256], sizes = [8, 64], strides = [1, 1]} : vector<8x384xf32> to vector<8x64xf32>
    %100 = arith.truncf %99 : vector<8x64xf32> to vector<8x64xbf16>
    "tpu.trace_start"() <{level = 10 : i32, message = "td,sd->ts"}> : () -> ()
    %cst_30 = arith.constant dense<0.000000e+00> : vector<8x8xf32>
    %101 = tpu.matmul %96, %98, %cst_30 {dimension_numbers = #tpu.dot_dimension_numbers<[1], [1], [0], [0], [0, 0, 1, 0], [], []>} : vector<8x64xbf16>, vector<8x64xbf16>, vector<8x8xf32> -> vector<8x8xf32>
    %cst_31 = arith.constant 0xFF800000 : f32
    "tpu.trace_stop"() : () -> ()
    %102 = vector.broadcast %cst_31 : f32 to vector<8x8xf32>
    %103 = arith.select %10, %101, %102 : vector<8x8xi1>, vector<8x8xf32>
    %cst_32 = arith.constant dense<0xFF800000> : vector<8xf32>
    %104 = vector.multi_reduction <maximumf>, %103, %cst_32 [1] : vector<8x8xf32> to vector<8xf32>
    %105 = vector.shape_cast %104 : vector<8xf32> to vector<8x1xf32>
    %106 = vector.broadcast %105 : vector<8x1xf32> to vector<8x8xf32>
    %107 = arith.subf %103, %106 : vector<8x8xf32>
    %108 = math.exp %107 : vector<8x8xf32>
    %cst_33 = arith.constant dense<0.000000e+00> : vector<8xf32>
    %109 = vector.multi_reduction <add>, %108, %cst_33 [1] : vector<8x8xf32> to vector<8xf32>
    %110 = vector.shape_cast %109 : vector<8xf32> to vector<8x1xf32>
    %111 = arith.truncf %108 : vector<8x8xf32> to vector<8x8xbf16>
    %cst_34 = arith.constant dense<0.000000e+00> : vector<8x64xf32>
    %112 = tpu.matmul %111, %100, %cst_34 {dimension_numbers = #tpu.dot_dimension_numbers<[1], [0], [0], [1], [0, 0, 1, 1], [], []>} : vector<8x8xbf16>, vector<8x64xbf16>, vector<8x64xf32> -> vector<8x64xf32>
    %113 = tpu.reciprocal %110 {approx = true} : vector<8x1xf32> -> vector<8x1xf32>
    %114 = vector.broadcast %113 : vector<8x1xf32> to vector<8x64xf32>
    %115 = arith.mulf %112, %114 : vector<8x64xf32>
    %116 = vector.extract_strided_slice %3 {offsets = [0, 320], sizes = [8, 64], strides = [1, 1]} : vector<8x384xf32> to vector<8x64xf32>
    %117 = arith.truncf %116 : vector<8x64xf32> to vector<8x64xbf16>
    %118 = vector.extract_strided_slice %5 {offsets = [0, 320], sizes = [8, 64], strides = [1, 1]} : vector<8x384xf32> to vector<8x64xf32>
    %119 = arith.truncf %118 : vector<8x64xf32> to vector<8x64xbf16>
    %120 = vector.extract_strided_slice %7 {offsets = [0, 320], sizes = [8, 64], strides = [1, 1]} : vector<8x384xf32> to vector<8x64xf32>
    %121 = arith.truncf %120 : vector<8x64xf32> to vector<8x64xbf16>
    "tpu.trace_start"() <{level = 10 : i32, message = "td,sd->ts"}> : () -> ()
    %cst_35 = arith.constant dense<0.000000e+00> : vector<8x8xf32>
    %122 = tpu.matmul %117, %119, %cst_35 {dimension_numbers = #tpu.dot_dimension_numbers<[1], [1], [0], [0], [0, 0, 1, 0], [], []>} : vector<8x64xbf16>, vector<8x64xbf16>, vector<8x8xf32> -> vector<8x8xf32>
    %cst_36 = arith.constant 0xFF800000 : f32
    "tpu.trace_stop"() : () -> ()
    %123 = vector.broadcast %cst_36 : f32 to vector<8x8xf32>
    %124 = arith.select %10, %122, %123 : vector<8x8xi1>, vector<8x8xf32>
    %cst_37 = arith.constant dense<0xFF800000> : vector<8xf32>
    %125 = vector.multi_reduction <maximumf>, %124, %cst_37 [1] : vector<8x8xf32> to vector<8xf32>
    %126 = vector.shape_cast %125 : vector<8xf32> to vector<8x1xf32>
    %127 = vector.broadcast %126 : vector<8x1xf32> to vector<8x8xf32>
    %128 = arith.subf %124, %127 : vector<8x8xf32>
    %129 = math.exp %128 : vector<8x8xf32>
    %cst_38 = arith.constant dense<0.000000e+00> : vector<8xf32>
    %130 = vector.multi_reduction <add>, %129, %cst_38 [1] : vector<8x8xf32> to vector<8xf32>
    %131 = vector.shape_cast %130 : vector<8xf32> to vector<8x1xf32>
    %132 = arith.truncf %129 : vector<8x8xf32> to vector<8x8xbf16>
    %cst_39 = arith.constant dense<0.000000e+00> : vector<8x64xf32>
    %133 = tpu.matmul %132, %121, %cst_39 {dimension_numbers = #tpu.dot_dimension_numbers<[1], [0], [0], [1], [0, 0, 1, 1], [], []>} : vector<8x8xbf16>, vector<8x64xbf16>, vector<8x64xf32> -> vector<8x64xf32>
    %134 = tpu.reciprocal %131 {approx = true} : vector<8x1xf32> -> vector<8x1xf32>
    %135 = vector.broadcast %134 : vector<8x1xf32> to vector<8x64xf32>
    %136 = arith.mulf %133, %135 : vector<8x64xf32>
    %137 = tpu.concatenate %31, %52, %73, %94, %115, %136 in 1 : vector<8x64xf32>, vector<8x64xf32>, vector<8x64xf32>, vector<8x64xf32>, vector<8x64xf32>, vector<8x64xf32> -> vector<8x384xf32>
    %c0_40 = arith.constant 0 : index
    %c0_41 = arith.constant 0 : index
    %c0_42 = arith.constant 0 : index
    %138 = vector.load %arg5[%c0_40, %c0_41, %c0_42] : memref<1x8x384xf32, #tpu.memory_space<vmem>>, vector<1x8x384xf32>
    %139 = vector.shape_cast %138 : vector<1x8x384xf32> to vector<8x384xf32>
    %140 = vector.shape_cast %137 : vector<8x384xf32> to vector<1x8x384xf32>
    tpu.vector_store %arg5[%c0_40, %c0_41, %c0_42], %140 {strides = array<i32>} : memref<1x8x384xf32, #tpu.memory_space<vmem>>, vector<1x8x384xf32>,
    return
  }
  func.func @transform_0(%arg0: i32) -> (i32, i32, i32) {
    %c0_i32 = arith.constant 0 : i32
    %c0_i32_0 = arith.constant 0 : i32
    %c0_i32_1 = arith.constant 0 : i32
    return %arg0, %c0_i32, %c0_i32_0 : i32, i32, i32
  }
  func.func @transform_1(%arg0: i32) -> (i32, i32) {
    %c0_i32 = arith.constant 0 : i32
    %c0_i32_0 = arith.constant 0 : i32
    %c0_i32_1 = arith.constant 0 : i32
    return %c0_i32, %c0_i32_0 : i32, i32
  }
  func.func @transform_2(%arg0: i32) -> (i32, i32) {
    %c0_i32 = arith.constant 0 : i32
    %c0_i32_0 = arith.constant 0 : i32
    %c0_i32_1 = arith.constant 0 : i32
    return %c0_i32, %c0_i32_0 : i32, i32
  }
  func.func @transform_3(%arg0: i32) -> (i32, i32) {
    %c0_i32 = arith.constant 0 : i32
    %c0_i32_0 = arith.constant 0 : i32
    %c0_i32_1 = arith.constant 0 : i32
    return %c0_i32, %c0_i32_0 : i32, i32
  }
  func.func @transform_4(%arg0: i32) -> (i32, i32, i32) {
    %c0_i32 = arith.constant 0 : i32
    %c0_i32_0 = arith.constant 0 : i32
    %c0_i32_1 = arith.constant 0 : i32
    return %arg0, %c0_i32, %c0_i32_0 : i32, i32, i32
  }
}

</mosaic_0001>

<bundles_post_ra>
// kernel: tpu_custom_call.1
= control target key start
LH: loop header
LB: loop body
LE: loop exit
PB: predicated region body
PF: predicated region fallthrough
CT: control target
= control target key end

     0   :  { %9 = vsyncpa [#allocation3], 0  ;;  %s4603_s0 = inlined_call_operand.hbm [shape: bf16[2,8,384], index: 0, kind: input, shape index: {}]   ;;  %s4604_s1 = inlined_call_operand.hbm [shape: bf16[384,384], index: 1, kind: input, shape index: {}]   ;;  %s4605_s2 = inlined_call_operand.hbm [shape: bf16[384,384], index: 2, kind: input, shape index: {}]   ;;  %s4606_s3 = inlined_call_operand.hbm [shape: bf16[384,384], index: 3, kind: input, shape index: {}]   ;;  %s4607_s4 = inlined_call_operand.hbm [shape: f32[2,8,384], index: 4, kind: output, shape index: {}]  }
   0x1   :  { %11 = vsyncpa [#allocation3 + $0x1], 0 }
   0x2   :  { %12 = vsyncpa [#allocation6], 0 }
   0x3   :  { %13 = vsyncpa [#allocation9], 0 }
   0x4   :  { %14 = vsyncpa [#allocation4], 0 }
   0x5   :  { %16 = vsyncpa [#allocation4 + $0x1], 0  ;;  %s4140_s15 = smov 0   ;;  %s4142_s16 = smov 0  }
   0x6   :  { %s4144_s17 = smov 0   ;;  %s4146_s18 = smov 0  }
   0x7 LB: > { %s4161_s19 = sadd.s32 4294967295, %s4102_s18   ;;  %s3004_s20 = sadd.s32 4294967294, %s4102_s18   ;;  %s4102_s18 = sphi %s4146_s18, %s4632_s18   ;;  %s4098_s17 = sphi %s4144_s17, %s4631_s17   ;;  %s4094_s16 = sphi %s4142_s16, %s4630_s16   ;;  %s4090_s15 = sphi %s4140_s15, %s4629_s15  }
   0x8   : > { %p42_p0 = scmp.ne.s32.totalorder %s4094_s16, %s4090_s15  ;;  %p4608_p1 = scmp.eq.s32.totalorder %s4161_s19, 0 }
   0x9   : > { %p135_p3 = scmp.eq.s32.totalorder %s3004_s20, 1  ;;  %p3005_p5 = scmp.ge.s32.totalorder %s4102_s18, 1 }
   0xa   : > { %p4170_p4 = por %p4608_p1, %p42_p0  ;;  %p142_p7 = scmp.lt.s32.totalorder %s4102_s18, 3 }
   0xb   : > { %p4175_p6 = por %p135_p3, %p42_p0  ;;  %s4104_s24 = smov [#allocation5]  }
   0xc   : > { %s4611_s21 = scalar_select %p4170_p4, 1, 0 }
   0xd   : > { %s4612_s22 = scalar_select %p4175_p6, 1, 0 }
   0xe   : > { %p4180_p8 = pnand %p3005_p5, %p142_p7  ;;  %s154_s25 = sshll.u32 %s4104_s24, 4  ;;  %s4184_s25 = int_to_ptr.vmem [resolvable:$true] %s154_s25 }
   0xf   : > { %s4105_s27 = smov [#allocation7]   ;;  %s4106_s29 = smov [#allocation8]  }
  0x10   : > { %s4613_s23 = scalar_select %p4180_p8, 1, 0 }
  0x11   : > { %p3531_p9 = pneg %p4180_p8  ;;  %s167_s28 = sshll.u32 %s4105_s27, 4  ;;  %s4195_s28 = int_to_ptr.vmem [resolvable:$true] %s167_s28 }
  0x12   : > { %s4197_s30 = sshll.u32 %s4106_s29, 4  ;;  %s3914_s7 = scalar_lea.hbm %s4604_s1, 9216  ;;  %s181_s30 = int_to_ptr.vmem [resolvable:$true] %s4197_s30 }
  0x13   : > { %p4191_p11 = pnand %p3531_p9, %p4608_p1  ;;  %p3915_p12 = scmp.ne.s32.totalorder %s4604_s1, %s3914_s7 }
  0x14   : > { %p3921_p5 = scmp.lt.u32.totalorder %s3914_s7, %s4604_s1 }
  0x15   : > { %p4207_p13 = pneg %p4191_p11 }
  0x17   : > { %p3917_p0 = pnand %p4207_p13, %p3915_p12 }
  0x19   : > { %p3918_p3 = pneg %p3917_p0 }
  0x1b   : > { %p3923_p7 = pnand %p3921_p5, %p3918_p3 }
  0x1d   : > { %3926 = shalt.err (!%p3923_p7)
}
  0x1e   : > { %s3927_s13 = scalar_lea.vmem %s4184_s25, 9216  ;;  %p3935_p2 = scmp.lt.s32.totalorder %s4184_s25, %s4184_s25 }
  0x1f   : > { %p3928_p9 = scmp.ne.s32.totalorder %s4184_s25, %s3927_s13  ;;  %p3936_p6 = scmp.lt.s32.totalorder %s3927_s13, %s3927_s13 }
  0x21   : > { %p3930_p10 = pnand %p3928_p9, %p4207_p13  ;;  %p3937_p12 = por %p3936_p6, %p3935_p2 }
  0x23   : > { %p3931_p1 = pneg %p3930_p10 }
  0x25   : > { %p3938_p0 = pnand %p3937_p12, %p3931_p1 }
  0x27   : > { %3941 = shalt.err (!%p3938_p0)
}
  0x28   : > { %s4107_s14 = smov 192   ;;  %s4108_s20 = smov 12  }
  0x29   : > { %3534 = dma.hbm_to_vmem [thread:$0]  (!%p4191_p11), %s4604_s1, 9216, %s4184_s25, [#allocation6], %s4107_s14, %s4107_s14, %s4108_s20  }
  0x2a   : > { %s3942_s6 = scalar_lea.hbm %s4605_s2, 9216 }
  0x2b   : > { %p3943_p1 = scmp.ne.s32.totalorder %s4605_s2, %s3942_s6  ;;  %p3949_p10 = scmp.lt.u32.totalorder %s3942_s6, %s4605_s2 }
  0x2d   : > { %p3945_p2 = pnand %p3943_p1, %p4207_p13 }
  0x2f   : > { %p3946_p6 = pneg %p3945_p2 }
  0x31   : > { %p3951_p3 = pnand %p3949_p10, %p3946_p6 }
  0x33   : > { %3954 = shalt.err (!%p3951_p3)
}
  0x34   : > { %s3955_s25 = scalar_lea.vmem %s4195_s28, 9216  ;;  %p3963_p12 = scmp.lt.s32.totalorder %s4195_s28, %s4195_s28 }
  0x35   : > { %p3956_p5 = scmp.ne.s32.totalorder %s4195_s28, %s3955_s25  ;;  %p3964_p0 = scmp.lt.s32.totalorder %s3955_s25, %s3955_s25 }
  0x37   : > { %p3958_p7 = pnand %p3956_p5, %p4207_p13  ;;  %p3965_p1 = por %p3964_p0, %p3963_p12 }
  0x39   : > { %p3959_p9 = pneg %p3958_p7 }
  0x3b   : > { %p3966_p2 = pnand %p3965_p1, %p3959_p9 }
  0x3d   : > { %3969 = shalt.err (!%p3966_p2)
}
  0x3e   : > { %3537 = dma.hbm_to_vmem [thread:$0]  (!%p4191_p11), %s4605_s2, 9216, %s4195_s28, [#allocation6], %s4107_s14, %s4107_s14, %s4108_s20  }
  0x3f   : > { %s3970_s29 = scalar_lea.hbm %s4606_s3, 9216 }
  0x40   : > { %p3971_p6 = scmp.ne.s32.totalorder %s4606_s3, %s3970_s29  ;;  %p3977_p5 = scmp.lt.u32.totalorder %s3970_s29, %s4606_s3 }
  0x42   : > { %p3973_p10 = pnand %p3971_p6, %p4207_p13 }
  0x44   : > { %p3974_p3 = pneg %p3973_p10 }
  0x46   : > { %p3979_p7 = pnand %p3977_p5, %p3974_p3 }
  0x48   : > { %3982 = shalt.err (!%p3979_p7)
}
  0x49   : > { %s3983_s9 = scalar_lea.vmem %s181_s30, 9216  ;;  %p3991_p1 = scmp.lt.s32.totalorder %s181_s30, %s181_s30 }
  0x4a   : > { %p3984_p9 = scmp.ne.s32.totalorder %s181_s30, %s3983_s9  ;;  %p3992_p2 = scmp.lt.s32.totalorder %s3983_s9, %s3983_s9 }
  0x4c   : > { %p3986_p12 = pnand %p3984_p9, %p4207_p13  ;;  %p3993_p4 = por %p3992_p2, %p3991_p1 }
  0x4e   : > { %p3987_p0 = pneg %p3986_p12 }
  0x50   : > { %p3994_p8 = pnand %p3993_p4, %p3987_p0 }
  0x52   : > { %3997 = shalt.err (!%p3994_p8)
}
  0x53   : > { %3540 = dma.hbm_to_vmem [thread:$0]  (!%p4191_p11), %s4606_s3, 9216, %s181_s30, [#allocation9], %s4107_s14, %s4107_s14, %s4108_s20  }
  0x54   : > { %s4280_s10 = sadd.s32 1, %s4102_s18   ;;  %s29_s25 = sadd.s32 1, %s4098_s17 }
  0x55   : > { %s26_s26 = ssub.s32 %s4102_s18, %s4280_s10  ;;  %p36_p8 = scmp.ne.s32.totalorder %s4098_s17, %s4094_s16 }
  0x56   : > { %p27_p4 = scmp.eq.s32.totalorder %s26_s26, 0  ;;  %p37_p13 = scmp.eq.s32.totalorder %s4102_s18, 0 }
  0x57   : > { %p3552_p6 = scmp.lt.s32.totalorder %s4102_s18, 2  ;;  %p4616_p3 = scmp.eq.s32.totalorder %s4161_s19, 1 }
  0x58   : > { %s4290_s12 = scalar_select %p27_p4, %s4098_s17, %s29_s25  }
  0x59   : > { %p38_p10 = por %p37_p13, %p36_p8  ;;  %p4294_p5 = por %p4616_p3, %p36_p8 }
  0x5a   : > { %s194_s24 = sand.u32 1, %s4098_s17   ;;  %s3511_s27 = smul.u32 192, %s4102_s18 }
  0x5b   : > { %s3510_s30 = smul.u32 12, %s194_s24  ;;  %p4300_p11 = pnand %p3552_p6, %p38_p10 }
  0x5c   : > { %s4307_s5 = scalar_lea.hbm %s4603_s0, %s3511_s27  ;;  %s195_s8 = scalar_lea.sflag [#allocation3], %s194_s24 }
  0x5d   : > { %s198_s6 = scalar_lea.vmem [#allocation2], %s3510_s30  ;;  %s3998_s9 = scalar_lea.hbm %s4307_s5, 192 }
  0x5e   : > { %s206_s7 = sshll.u32 %s198_s6, 4  ;;  %p3999_p7 = scmp.ne.s32.totalorder %s4307_s5, %s3998_s9  ;;  %s4309_s7 = int_to_ptr.vmem [resolvable:$true] %s206_s7 }
  0x5f   : > { %p4000_p9 = pneg %p4300_p11  ;;  %s4003_s26 = scalar_lea.hbm %s4603_s0, 384 }
  0x60   : > { %p4004_p1 = scmp.lt.u32.totalorder %s4307_s5, %s4603_s0  ;;  %p4005_p2 = scmp.lt.u32.totalorder %s4003_s26, %s3998_s9 }
  0x61   : > { %p4001_p12 = pnand %p4000_p9, %p3999_p7  ;;  %p4007_p8 = scmp.lt.u32.totalorder %s3998_s9, %s4307_s5 }
  0x62   : > { %p4006_p4 = por %p4005_p2, %p4004_p1 }
  0x63   : > { %p4002_p0 = pneg %p4001_p12 }
  0x64   : > { %p4008_p13 = por %p4007_p8, %p4006_p4 }
  0x66   : > { %p4009_p6 = pnand %p4008_p13, %p4002_p0 }
  0x68   : > { %4012 = shalt.err (!%p4009_p6)
}
  0x69   : > { %s4013_s24 = scalar_lea.vmem %s4309_s7, 192  ;;  %s4109_s30 = smov [#allocation2]  }
  0x6a   : > { %p4014_p10 = scmp.ne.s32.totalorder %s4309_s7, %s4013_s24  ;;  %s4018_s20 = sshll.u32 %s4109_s30, 4  ;;  %s4019_s20 = int_to_ptr.vmem [resolvable:$false] %s4018_s20 }
  0x6b   : > { %s4020_s29 = scalar_lea.vmem %s4019_s20, 384  ;;  %p4021_p12 = scmp.lt.s32.totalorder %s4309_s7, %s4019_s20 }
  0x6c   : > { %p4016_p3 = pnand %p4014_p10, %p4000_p9  ;;  %p4022_p1 = scmp.lt.s32.totalorder %s4020_s29, %s4013_s24 }
  0x6e   : > { %p4017_p7 = pneg %p4016_p3  ;;  %p4023_p2 = por %p4022_p1, %p4021_p12 }
  0x70   : > { %p4024_p4 = pnand %p4023_p2, %p4017_p7 }
  0x72   : > { %4027 = shalt.err (!%p4024_p4)
}
  0x73   : > { %3544 = dma.hbm_to_vmem [thread:$0]  (!%p4300_p11), %s4307_s5, 192, %s4309_s7, %s195_s8  }
  0x74   : > { %p4619_p0 = scmp.ne.s32.totalorder %s4613_s23, 0 }
  0x75   : > { %s4339_s6 = sand.u32 (!%p4619_p0), 1, %s4094_s16   ;;  %p4620_p9 = scmp.ne.s32.totalorder (!%p4619_p0), %s4611_s21, 0 }
  0x76   : > { %215 = sbr.rel (%p4619_p0) target bundleno = 1646 (0x66e), region = 36  ;;  %s218_s28 = scalar_lea.sflag (!%p4619_p0), [#allocation3], %s4339_s6 }
  0x77   : > { %s3512_s9 = smul.u32 (!%p4619_p0), 12, %s4339_s6 }
  0x79   : > { %s4343_s11 = scalar_lea.vmem (!%p4619_p0), [#allocation2], %s3512_s9 }
  0x7d   : > { %4073 = dma.done.wait (%p4620_p9), %s218_s28, 192  }
  0x7e   : > { %4075 = vsyncadd (%p4620_p9), %s218_s28, 4294967104  ;;  %p4621_p11 = scmp.eq.s32.totalorder %s4161_s19, 0 }
  0x80   : > { %4077 = dma.done.wait (%p4621_p11), [#allocation6], 18432   ;;  %p4622_p8 = pmov %p4621_p11 }
  0x82   : > { %4079 = vsyncadd (%p4622_p8), [#allocation6], 4294948864  ;;  %p4623_p13 = pmov %p4622_p8 }
  0x83   : > { %p4624_p6 = pmov %p4622_p8 }
  0x84   : > { %4081 = dma.done.wait (%p4623_p13), [#allocation9], 9216  }
  0x85   : > { %4083 = vsyncadd (%p4624_p6), [#allocation9], 4294958080  ;;  %v3598_v0 = vld [vmem:[#allocation5 + $0xc8] ss:$12 sps:$4 sm:$0xff]   ;;  %v3600_v2 = vld [vmem:[#allocation5 + $0xe0] ss:$12 sps:$4 sm:$0xff]  }
  0x86   : > { %v3599_v1 = vld [vmem:[#allocation5 + $0x8] ss:$12 sps:$4 sm:$0xff]   ;;  %3249 = vmatprep.subr.bf16.mxu1 %v3598_v0  ;;  %v3601_v3 = vld [vmem:[#allocation5 + $0x20] ss:$12 sps:$4 sm:$0xff]   ;;  %v3602_v4 = vld [vmem:[#allocation5 + $0x4] ss:$12 sps:$4 sm:$0xff]  }
  0x87   : > { %3250 = vmatpush3.bf16.msra.mxu1 %v3599_v1  ;;  %v3604_v5 = vld [vmem:[#allocation5] ss:$12 sps:$4 sm:$0xff]   ;;  %752 = vmatprep.subr.bf16.mxu0 %v3602_v4  ;;  %v3605_v6 = vld [vmem:[#allocation5 + $0xf8] ss:$12 sps:$4 sm:$0xff]   ;;  %v3607_v8 = vld [vmem:[#allocation5 + $0x1c] ss:$12 sps:$4 sm:$0xff]  }
  0x88   : > { %3251 = vmatprep.subr.bf16.mxu1 %v3600_v2  ;;  %753 = vmatpush1.bf16.msra.mxu0 %v3604_v5  ;;  %v3606_v7 = vld [vmem:[#allocation5 + $0x38] ss:$12 sps:$4 sm:$0xff]   ;;  %v3610_v10 = vld [vmem:[#allocation5 + $0x110] ss:$12 sps:$4 sm:$0xff]   ;;  %v3612_v12 = vld [vmem:[#allocation5 + $0x34] ss:$12 sps:$4 sm:$0xff]  }
  0x89   : > { %v3609_v9 = vld [vmem:[#allocation5 + $0x18] ss:$12 sps:$4 sm:$0xff]   ;;  %754 = vmatprep.subr.bf16.mxu0 %v3607_v8  ;;  %v3611_v11 = vld [vmem:[#allocation5 + $0x50] ss:$12 sps:$4 sm:$0xff]   ;;  %v3615_v14 = vld [vmem:[#allocation5 + $0x128] ss:$12 sps:$4 sm:$0xff]  }
  0x8a   : > { %v3614_v13 = vld [vmem:[#allocation5 + $0x30] ss:$12 sps:$4 sm:$0xff]   ;;  %v3616_v15 = vld [vmem:[#allocation5 + $0x68] ss:$12 sps:$4 sm:$0xff]   ;;  %v3617_v16 = vld [vmem:[#allocation5 + $0x4c] ss:$12 sps:$4 sm:$0xff]  }
  0x8b   : > { %3252 = vmatpush3.bf16.msra.mxu1 %v3601_v3  ;;  %v3619_v17 = vld [vmem:[#allocation5 + $0x48] ss:$12 sps:$4 sm:$0xff]   ;;  %v3620_v18 = vld [vmem:[#allocation5 + $0x140] ss:$12 sps:$4 sm:$0xff]   ;;  %v3622_v20 = vld [vmem:[#allocation5 + $0x64] ss:$12 sps:$4 sm:$0xff]  }
  0x8c   : > { %3253 = vmatprep.subr.bf16.mxu1 %v3605_v6  ;;  %755 = vmatpush1.bf16.msra.mxu0 %v3609_v9  ;;  %v3621_v19 = vld [vmem:[#allocation5 + $0x80] ss:$12 sps:$4 sm:$0xff]   ;;  %v3625_v22 = vld [vmem:[#allocation5 + $0x158] ss:$12 sps:$4 sm:$0xff]   ;;  %v3627_v24 = vld [vmem:[#allocation5 + $0x7c] ss:$12 sps:$4 sm:$0xff]  }
  0x8d   : > { %756 = vmatprep.subr.bf16.mxu0 %v3612_v12  ;;  %v3624_v21 = vld [vmem:[#allocation5 + $0x60] ss:$12 sps:$4 sm:$0xff]   ;;  %v3626_v23 = vld [vmem:[#allocation5 + $0x98] ss:$12 sps:$4 sm:$0xff]   ;;  %v3630_v26 = vld [vmem:[#allocation5 + $0x170] ss:$12 sps:$4 sm:$0xff]  }
  0x8e   : > { %v3629_v25 = vld [vmem:[#allocation5 + $0x78] ss:$12 sps:$4 sm:$0xff]   ;;  %v3632_v27 = vld [vmem:[#allocation5 + $0x94] ss:$12 sps:$4 sm:$0xff]   ;;  %v3631_v30 = vld [vmem:[#allocation5 + $0xb0] ss:$12 sps:$4 sm:$0xff]  }
  0x8f   : > { %3254 = vmatpush3.bf16.msra.mxu1 %v3606_v7  ;;  %v259_v28 = vld [vmem:[%s4343_s11] sm:$0xff]  ;;  %v3635_v31 = vld [vmem:[#allocation5 + $0x90] ss:$12 sps:$4 sm:$0xff]   ;;  %v4110_v36 = vmov 0.0   ;;  %vm4111_vm0 = vmmov 0   ;;  %v4112_v9 = vmov 0  }
  0x90   : > { %3255 = vmatprep.subr.bf16.mxu1 %v3610_v10  ;;  %757 = vmatpush1.bf16.msra.mxu0 %v3614_v13  ;;  %v4358_v29 = vcombine.high %v259_v28, %v259_v28  ;;  %v3638_v32 = vld [vmem:[#allocation5 + $0xac] ss:$12 sps:$4 sm:$0xff]   ;;  %v4362_v33 = vcombine.low %v259_v28, %v259_v28  ;;  %v3637_v34 = vld [vmem:[#allocation5 + $0x188] ss:$12 sps:$4 sm:$0xff]   ;;  %v3642_v37 = vld [vmem:[#allocation5 + $0xc4] ss:$12 sps:$4 sm:$0xff]  }
  0x91   : > { %758 = vmatprep.subr.bf16.mxu0 %v3617_v16  ;;  %v3640_v35 = vld [vmem:[#allocation5 + $0xa8] ss:$12 sps:$4 sm:$0xff]   ;;  %v3641_v38 = vld [vmem:[#allocation5 + $0x1a0] ss:$12 sps:$4 sm:$0xff]   ;;  %v3645_v41 = vld [vmem:[#allocation5 + $0x1b8] ss:$12 sps:$4 sm:$0xff]  }
  0x92   : > { %866 = vmatprep.mubr.bf16.mxu1 %v4358_v29  ;;  %784 = vmatprep.mubr.bf16.mxu0 %v4358_v29  ;;  %v3644_v39 = vld [vmem:[#allocation5 + $0xc0] ss:$12 sps:$4 sm:$0xff]   ;;  %v3646_v40 = vld [vmem:[#allocation5 + $0xdc] ss:$12 sps:$4 sm:$0xff]   ;;  %v3648_v42 = vld [vmem:[#allocation5 + $0xd8] ss:$12 sps:$4 sm:$0xff]  }
  0x93   : > { %3256 = vmatpush3.bf16.msra.mxu1 %v3611_v11  ;;  %v3650_v43 = vld [vmem:[#allocation5 + $0xf4] ss:$12 sps:$4 sm:$0xff]   ;;  %v3649_v44 = vld [vmem:[#allocation5 + $0x1d0] ss:$12 sps:$4 sm:$0xff]   ;;  %v3654_v46 = vld [vmem:[#allocation5 + $0x10c] ss:$12 sps:$4 sm:$0xff]  }
  0x94   : > { %3257 = vmatprep.subr.bf16.mxu1 %v3615_v14  ;;  %759 = vmatpush1.bf16.msra.mxu0 %v3619_v17  ;;  %v3652_v45 = vld [vmem:[#allocation5 + $0xf0] ss:$12 sps:$4 sm:$0xff]   ;;  %v3653_v47 = vld [vmem:[#allocation5 + $0x1e8] ss:$12 sps:$4 sm:$0xff]   ;;  %v3657_v50 = vld [vmem:[#allocation5 + $0x200] ss:$12 sps:$4 sm:$0xff]  }
  0x95   : > { %760 = vmatprep.subr.bf16.mxu0 %v3622_v20  ;;  %v3656_v48 = vld [vmem:[#allocation5 + $0x108] ss:$12 sps:$4 sm:$0xff]   ;;  %v3658_v49 = vld [vmem:[#allocation5 + $0x124] ss:$12 sps:$4 sm:$0xff]   ;;  %v3660_v51 = vld [vmem:[#allocation5 + $0x120] ss:$12 sps:$4 sm:$0xff]  }
  0x96   : > { %v3662_v52 = vld [vmem:[#allocation5 + $0x13c] ss:$12 sps:$4 sm:$0xff]   ;;  %v3661_v53 = vld [vmem:[#allocation5 + $0x218] ss:$12 sps:$4 sm:$0xff]   ;;  %v3666_v55 = vld [vmem:[#allocation5 + $0x154] ss:$12 sps:$4 sm:$0xff]  }
  0x97   : > { %3258 = vmatpush3.bf16.msra.mxu1 %v3616_v15  ;;  %v3664_v54 = vld [vmem:[#allocation5 + $0x138] ss:$12 sps:$4 sm:$0xff]   ;;  %v3665_v56 = vld [vmem:[#allocation5 + $0x230] ss:$12 sps:$4 sm:$0xff]   ;;  %v3670_v61 = vld [vmem:[#allocation7] ss:$12 sps:$4 sm:$0xff]  }
  0x98   : > { %3259 = vmatprep.subr.bf16.mxu1 %v3620_v18  ;;  %761 = vmatpush1.bf16.msra.mxu0 %v3624_v21  ;;  %v3668_v57 = vld [vmem:[#allocation5 + $0x150] ss:$12 sps:$4 sm:$0xff]   ;;  %v3673_v59 = vld [vmem:[#allocation5 + $0x16c] ss:$12 sps:$4 sm:$0xff]   ;;  %v3675_v62 = vld [vmem:[#allocation5 + $0x168] ss:$12 sps:$4 sm:$0xff]  }
  0x99   : > { %762 = vmatprep.subr.bf16.mxu0 %v3627_v24  ;;  %v3672_v58 = vld [vmem:[#allocation7 + $0x4] ss:$12 sps:$4 sm:$0xff]   ;;  %v3678_v63 = vld [vmem:[#allocation7 + $0x1c] ss:$12 sps:$4 sm:$0xff]   ;;  %v3679_v2 = vld [vmem:[#allocation5 + $0x180] ss:$12 sps:$4 sm:$0xff]  }
  0x9a   : > { %v4376_v60 = vld [vmem:[%s4343_s11 + $0x8] ss:$0 sps:$4 sm:$0xff]   ;;  %v3676_v1 = vld [vmem:[#allocation7 + $0x18] ss:$12 sps:$4 sm:$0xff]   ;;  %v3684_v3 = vld [vmem:[#allocation7 + $0x34] ss:$12 sps:$4 sm:$0xff]  }
  0x9b   : > { %3260 = vmatpush3.bf16.msra.mxu1 %v3621_v19  ;;  %v3681_v0 = vld [vmem:[#allocation5 + $0x184] ss:$12 sps:$4 sm:$0xff]   ;;  %v3687_v4 = vld [vmem:[#allocation5 + $0x19c] ss:$12 sps:$4 sm:$0xff]   ;;  %v3690_v7 = vld [vmem:[#allocation7 + $0x4c] ss:$12 sps:$4 sm:$0xff]  }
  0x9c   : > { %3261 = vmatprep.subr.bf16.mxu1 %v3625_v22  ;;  %763 = vmatpush1.bf16.msra.mxu0 %v3629_v25  ;;  %v3682_v5 = vld [vmem:[#allocation7 + $0x30] ss:$12 sps:$4 sm:$0xff]   ;;  %v3685_v6 = vld [vmem:[#allocation5 + $0x198] ss:$12 sps:$4 sm:$0xff]   ;;  %v3693_v8 = vld [vmem:[#allocation5 + $0x1b4] ss:$12 sps:$4 sm:$0xff]  }
  0x9d   : > { %764 = vmatprep.subr.bf16.mxu0 %v3632_v27  ;;  %v3688_v10 = vld [vmem:[#allocation7 + $0x48] ss:$12 sps:$4 sm:$0xff]   ;;  %v3691_v11 = vld [vmem:[#allocation5 + $0x1b0] ss:$12 sps:$4 sm:$0xff]   ;;  %v3699_v13 = vld [vmem:[#allocation5 + $0x1cc] ss:$12 sps:$4 sm:$0xff]  }
  0x9e   : > { %v3696_v12 = vld [vmem:[#allocation7 + $0x64] ss:$12 sps:$4 sm:$0xff]   ;;  %v3694_v14 = vld [vmem:[#allocation7 + $0x60] ss:$12 sps:$4 sm:$0xff]   ;;  %v3697_v15 = vld [vmem:[#allocation5 + $0x1c8] ss:$12 sps:$4 sm:$0xff]  }
  0x9f   : > { %3262 = vmatpush3.bf16.msra.mxu1 %v3626_v23  ;;  %v3702_v16 = vld [vmem:[#allocation7 + $0x7c] ss:$12 sps:$4 sm:$0xff]   ;;  %v3705_v17 = vld [vmem:[#allocation5 + $0x1e4] ss:$12 sps:$4 sm:$0xff]   ;;  %v3703_v19 = vld [vmem:[#allocation5 + $0x1e0] ss:$12 sps:$4 sm:$0xff]  }
  0xa0   : > { %3263 = vmatprep.subr.bf16.mxu1 %v3630_v26  ;;  %765 = vmatpush1.bf16.msra.mxu0 %v3635_v31  ;;  %v3700_v18 = vld [vmem:[#allocation7 + $0x78] ss:$12 sps:$4 sm:$0xff]   ;;  %v3708_v20 = vld [vmem:[#allocation7 + $0x94] ss:$12 sps:$4 sm:$0xff]   ;;  %v3711_v21 = vld [vmem:[#allocation5 + $0x1fc] ss:$12 sps:$4 sm:$0xff]  }
  0xa1   : > { %766 = vmatprep.subr.bf16.mxu0 %v3638_v32  ;;  %v3706_v22 = vld [vmem:[#allocation7 + $0x90] ss:$12 sps:$4 sm:$0xff]   ;;  %v3709_v23 = vld [vmem:[#allocation5 + $0x1f8] ss:$12 sps:$4 sm:$0xff]   ;;  %v3717_v25 = vld [vmem:[#allocation5 + $0x214] ss:$12 sps:$4 sm:$0xff]  }
  0xa2   : > { %v3714_v24 = vld [vmem:[#allocation7 + $0xac] ss:$12 sps:$4 sm:$0xff]   ;;  %v3712_v26 = vld [vmem:[#allocation7 + $0xa8] ss:$12 sps:$4 sm:$0xff]   ;;  %v3715_v27 = vld [vmem:[#allocation5 + $0x210] ss:$12 sps:$4 sm:$0xff]  }
  0xa3   : > { %3264 = vmatpush3.bf16.msra.mxu1 %v3631_v30  ;;  %v3720_v28 = vld [vmem:[#allocation7 + $0xc4] ss:$12 sps:$4 sm:$0xff]   ;;  %v3723_v30 = vld [vmem:[#allocation5 + $0x22c] ss:$12 sps:$4 sm:$0xff]   ;;  %v3721_v32 = vld [vmem:[#allocation5 + $0x228] ss:$12 sps:$4 sm:$0xff]  }
  0xa4   : > { %3366 = vmatprep.subr.bf16.mxu1 %v4110_v36  ;;  %767 = vmatpush1.bf16.msra.mxu0 %v3640_v35  ;;  %v3718_v31 = vld [vmem:[#allocation7 + $0xc0] ss:$12 sps:$4 sm:$0xff]   ;;  %v3727_v35 = vld [vmem:[#allocation7 + $0xc8] ss:$12 sps:$4 sm:$0xff]   ;;  %s4113_s21 = smov 64   ;;  %vm2206_vm1 = vcmask 523264  }
  0xa5   : > { %768 = vmatprep.subr.bf16.mxu0 %v3642_v37  ;;  %v3724_v37 = vld [vmem:[#allocation7 + $0xd8] ss:$12 sps:$4 sm:$0xff]   ;;  %vm2268_vm2 = vcmask 1043456   ;;  %vm2254_vm4 = vcmask 64512   ;;  %s3513_s23 = smul.u32 24, %s4339_s6  ;;  %s2891_s27 = scalar_lea.sflag [#allocation4], %s4339_s6 }
  0xa6   : > { %867 = vmatmul.mubr.bf16.vlgmr.msra.gmra.mrb[0].mxu1 %v4362_v33  ;;  %s3514_s5 = smul.u32 384, %s4161_s19  ;;  %s4114_s19 = smov [#allocation10]  }
  0xa7   : > { %3367 = vmatpush3.bf16.msra.mxu1 %v3637_v34  ;;  %3382 = vmatprep.mubr.msk.bf16.mxu1 %vm4111_vm0, %v4110_v36  ;;  %v3726_v34 = vld [vmem:[#allocation7 + $0xdc] ss:$12 sps:$4 sm:$0xff]   ;;  %s257_s14 = scalar_lea.vmem [#allocation10], %s3513_s23  ;;  %s4032_s30 = sshll.u32 %s4114_s19, 4  ;;  %s4033_s30 = int_to_ptr.vmem [resolvable:$false] %s4032_s30 }
  0xa8   : > { %3368 = vmatprep.subr.bf16.mxu1 %v4110_v36  ;;  %769 = vmatpush1.bf16.msra.mxu0 %v3644_v39  ;;  %v3730_v39 = vld [vmem:[#allocation7 + $0xf4] ss:$12 sps:$4 sm:$0xff]   ;;  %s2905_s7 = sshll.u32 %s257_s14, 4  ;;  %s4558_s25 = scalar_lea.hbm %s4607_s4, %s3514_s5  ;;  %s4560_s7 = int_to_ptr.vmem [resolvable:$true] %s2905_s7 }
  0xa9   : > { %770 = vmatprep.subr.bf16.mxu0 %v3646_v40  ;;  %v3732_v40 = vld [vmem:[#allocation7 + $0xe0] ss:$12 sps:$4 sm:$0xff]   ;;  %s4028_s24 = scalar_lea.vmem %s4560_s7, 384  ;;  %s4034_s20 = scalar_lea.vmem %s4033_s30, 768 }
  0xaa   : > { %p4029_p10 = scmp.ne.s32.totalorder %s4560_s7, %s4028_s24  ;;  %p4035_p12 = scmp.lt.s32.totalorder %s4560_s7, %s4033_s30 }
  0xab   : > { %3369 = vmatpush3.bf16.msra.mxu1 %v3641_v38  ;;  %v3731_v38 = vld [vmem:[#allocation7 + $0x8] ss:$12 sps:$4 sm:$0xff]   ;;  %p4036_p1 = scmp.lt.s32.totalorder %s4034_s20, %s4028_s24 }
  0xac   : > { %3370 = vmatprep.subr.bf16.mxu1 %v4110_v36  ;;  %771 = vmatpush1.bf16.msra.mxu0 %v3648_v42  ;;  %v3735_v42 = vld [vmem:[#allocation7 + $0x10c] ss:$12 sps:$4 sm:$0xff]   ;;  %p4030_p3 = pnand %p4029_p10, %p4294_p5 }
  0xad   : > { %772 = vmatprep.subr.bf16.mxu0 %v3650_v43  ;;  %v3736_v43 = vld [vmem:[#allocation7 + $0x20] ss:$12 sps:$4 sm:$0xff]   ;;  %p4037_p2 = por %p4036_p1, %p4035_p12 }
  0xae   : > { %p4031_p7 = pneg %p4030_p3 }
  0xaf   : > { %3371 = vmatpush3.bf16.msra.mxu1 %v3645_v41  ;;  %v3728_v41 = vld [vmem:[#allocation7 + $0xf0] ss:$12 sps:$4 sm:$0xff]  }
  0xb0   : > { %3372 = vmatprep.subr.bf16.mxu1 %v4110_v36  ;;  %773 = vmatpush1.bf16.msra.mxu0 %v3652_v45  ;;  %v3733_v45 = vld [vmem:[#allocation7 + $0x108] ss:$12 sps:$4 sm:$0xff]   ;;  %p4038_p4 = pnand %p4037_p2, %p4031_p7 }
  0xb1   : > { %774 = vmatprep.subr.bf16.mxu0 %v3654_v46  ;;  %v3740_v46 = vld [vmem:[#allocation7 + $0x124] ss:$12 sps:$4 sm:$0xff]  }
  0xb3   : > { %3373 = vmatpush3.bf16.msra.mxu1 %v3649_v44  ;;  %v3737_v44 = vld [vmem:[#allocation7 + $0xf8] ss:$12 sps:$4 sm:$0xff]  }
  0xb4   : > { %3374 = vmatprep.subr.bf16.mxu1 %v4110_v36  ;;  %775 = vmatpush1.bf16.msra.mxu0 %v3656_v48  ;;  %v3742_v48 = vld [vmem:[#allocation7 + $0x110] ss:$12 sps:$4 sm:$0xff]  }
  0xb5   : > { %776 = vmatprep.subr.bf16.mxu0 %v3658_v49  ;;  %v3738_v49 = vld [vmem:[#allocation7 + $0x120] ss:$12 sps:$4 sm:$0xff]  }
  0xb7   : > { %3375 = vmatpush3.bf16.msra.mxu1 %v3653_v47  ;;  %v3741_v47 = vld [vmem:[#allocation7 + $0x38] ss:$12 sps:$4 sm:$0xff]  }
  0xb8   : > { %3376 = vmatprep.subr.bf16.mxu1 %v4110_v36  ;;  %777 = vmatpush1.bf16.msra.mxu0 %v3660_v51  ;;  %v3746_v51 = vld [vmem:[#allocation7 + $0x50] ss:$12 sps:$4 sm:$0xff]  }
  0xb9   : > { %778 = vmatprep.subr.bf16.mxu0 %v3662_v52  ;;  %v3747_v52 = vld [vmem:[#allocation7 + $0x128] ss:$12 sps:$4 sm:$0xff]  }
  0xbb   : > { %3377 = vmatpush3.bf16.msra.mxu1 %v3657_v50  ;;  %v3745_v50 = vld [vmem:[#allocation7 + $0x13c] ss:$12 sps:$4 sm:$0xff]  }
  0xbc   : > { %3378 = vmatprep.subr.bf16.mxu1 %v4110_v36  ;;  %779 = vmatpush1.bf16.msra.mxu0 %v3664_v54  ;;  %v3751_v54 = vld [vmem:[#allocation7 + $0x68] ss:$12 sps:$4 sm:$0xff]  }
  0xbd   : > { %780 = vmatprep.subr.bf16.mxu0 %v3666_v55  ;;  %v3750_v55 = vld [vmem:[#allocation7 + $0x154] ss:$12 sps:$4 sm:$0xff]  }
  0xbf   : > { %3379 = vmatpush3.bf16.msra.mxu1 %v3661_v53  ;;  %v3743_v53 = vld [vmem:[#allocation7 + $0x138] ss:$12 sps:$4 sm:$0xff]  }
  0xc0   : > { %3380 = vmatprep.subr.bf16.mxu1 %v4110_v36  ;;  %781 = vmatpush1.bf16.msra.mxu0 %v3668_v57  ;;  %v3748_v57 = vld [vmem:[#allocation7 + $0x150] ss:$12 sps:$4 sm:$0xff]  }
  0xc1   : > { %782 = vmatprep.subr.bf16.mxu0 %v3673_v59  ;;  %v3755_v59 = vld [vmem:[#allocation7 + $0x16c] ss:$12 sps:$4 sm:$0xff]  }
  0xc3   : > { %3381 = vmatpush3.bf16.msra.mxu1 %v3665_v56  ;;  %v3752_v56 = vld [vmem:[#allocation7 + $0x140] ss:$12 sps:$4 sm:$0xff]  }
  0xc4   : > { %1394 = vmatprep.subr.bf16.mxu1 %v3672_v58  ;;  %783 = vmatpush1.bf16.msra.mxu0 %v3675_v62  ;;  %v3756_v58 = vld [vmem:[#allocation7 + $0x80] ss:$12 sps:$4 sm:$0xff]   ;;  %v3753_v62 = vld [vmem:[#allocation7 + $0x168] ss:$12 sps:$4 sm:$0xff]  }
  0xc5   : > { %793 = vmatprep.subr.bf16.mxu0 %v3681_v0  ;;  %v3760_v0 = vld [vmem:[#allocation7 + $0x184] ss:$12 sps:$4 sm:$0xff]  }
  0xc6   : > { %3383 = vmatmul.mubr.bf16.vlgmr.msra.gmra.mrb[4].mxu1 %v4376_v60 }
  0xc7   : > { %1395 = vmatpush1.bf16.msra.mxu1 %v3670_v61  ;;  %1426 = vmatprep.mubr.bf16.mxu1 %v4358_v29  ;;  %v3757_v61 = vld [vmem:[#allocation7 + $0x158] ss:$12 sps:$4 sm:$0xff]  }
  0xc8   : > { %1396 = vmatprep.subr.bf16.mxu1 %v3678_v63  ;;  %785 = vmatmul.mubr.bf16.vlgmr.msra.gmra.mrb[0].mxu0 %v4362_v33  ;;  %v3761_v63 = vld [vmem:[#allocation7 + $0x98] ss:$12 sps:$4 sm:$0xff]  }
  0xc9   : > { %794 = vmatpush1.bf16.msra.mxu0 %v3679_v2  ;;  %825 = vmatprep.mubr.bf16.mxu0 %v4112_v9  ;;  %v3758_v2 = vld [vmem:[#allocation7 + $0x180] ss:$12 sps:$4 sm:$0xff]  }
  0xca   : > { %795 = vmatprep.subr.bf16.mxu0 %v3687_v4  ;;  %v3765_v4 = vld [vmem:[#allocation7 + $0x19c] ss:$12 sps:$4 sm:$0xff]  }
  0xcb   : > { %1397 = vmatpush1.bf16.msra.mxu1 %v3676_v1  ;;  %v3762_v1 = vld [vmem:[#allocation7 + $0x170] ss:$12 sps:$4 sm:$0xff]  }
  0xcc   : > { %1398 = vmatprep.subr.bf16.mxu1 %v3684_v3  ;;  %v3766_v3 = vld [vmem:[#allocation7 + $0xb0] ss:$12 sps:$4 sm:$0xff]  }
  0xcd   : > { %796 = vmatpush1.bf16.msra.mxu0 %v3685_v6  ;;  %v3770_v6 = vld [vmem:[#allocation7 + $0x188] ss:$12 sps:$4 sm:$0xff]  }
  0xce   : > { %797 = vmatprep.subr.bf16.mxu0 %v3693_v8  ;;  %v3767_v8 = vld [vmem:[#allocation7 + $0x1b0] ss:$12 sps:$4 sm:$0xff]  }
  0xcf   : > { %1399 = vmatpush1.bf16.msra.mxu1 %v3682_v5  ;;  %v3763_v5 = vld [vmem:[#allocation7 + $0x198] ss:$12 sps:$4 sm:$0xff]  }
  0xd0   : > { %1400 = vmatprep.subr.bf16.mxu1 %v3690_v7  ;;  %v3769_v7 = vld [vmem:[#allocation7 + $0x1b4] ss:$12 sps:$4 sm:$0xff]  }
  0xd1   : > { %798 = vmatpush1.bf16.msra.mxu0 %v3691_v11  ;;  %v3773_v11 = vld [vmem:[#allocation7 + $0x1cc] ss:$12 sps:$4 sm:$0xff]  }
  0xd2   : > { %799 = vmatprep.subr.bf16.mxu0 %v3699_v13  ;;  %v3778_v13 = vld [vmem:[#allocation7 + $0x1b8] ss:$12 sps:$4 sm:$0xff]  }
  0xd3   : > { %1401 = vmatpush1.bf16.msra.mxu1 %v3688_v10  ;;  %v3774_v10 = vld [vmem:[#allocation7 + $0x1a0] ss:$12 sps:$4 sm:$0xff]  }
  0xd4   : > { %1402 = vmatprep.subr.bf16.mxu1 %v3696_v12  ;;  %v3771_v12 = vld [vmem:[#allocation7 + $0x1c8] ss:$12 sps:$4 sm:$0xff]  }
  0xd5   : > { %800 = vmatpush1.bf16.msra.mxu0 %v3697_v15  ;;  %v3775_v15 = vld [vmem:[#allocation7 + $0x1e0] ss:$12 sps:$4 sm:$0xff]  }
  0xd6   : > { %801 = vmatprep.subr.bf16.mxu0 %v3705_v17  ;;  %v3781_v17 = vld [vmem:[#allocation7 + $0x1fc] ss:$12 sps:$4 sm:$0xff]  }
  0xd7   : > { %1403 = vmatpush1.bf16.msra.mxu1 %v3694_v14  ;;  %v3777_v14 = vld [vmem:[#allocation7 + $0x1e4] ss:$12 sps:$4 sm:$0xff]  }
  0xd8   : > { %1404 = vmatprep.subr.bf16.mxu1 %v3702_v16  ;;  %v3782_v16 = vld [vmem:[#allocation7 + $0x1d0] ss:$12 sps:$4 sm:$0xff]  }
  0xd9   : > { %802 = vmatpush1.bf16.msra.mxu0 %v3703_v19  ;;  %v3786_v19 = vld [vmem:[#allocation7 + $0x1e8] ss:$12 sps:$4 sm:$0xff]  }
  0xda   : > { %803 = vmatprep.subr.bf16.mxu0 %v3711_v21  ;;  %v3783_v21 = vld [vmem:[#allocation7 + $0x210] ss:$12 sps:$4 sm:$0xff]  }
  0xdb   : > { %1405 = vmatpush1.bf16.msra.mxu1 %v3700_v18  ;;  %v3779_v18 = vld [vmem:[#allocation7 + $0x1f8] ss:$12 sps:$4 sm:$0xff]  }
  0xdc   : > { %1406 = vmatprep.subr.bf16.mxu1 %v3708_v20  ;;  %v3785_v20 = vld [vmem:[#allocation7 + $0x214] ss:$12 sps:$4 sm:$0xff]  }
  0xdd   : > { %804 = vmatpush1.bf16.msra.mxu0 %v3709_v23  ;;  %v3789_v23 = vld [vmem:[#allocation7 + $0x22c] ss:$12 sps:$4 sm:$0xff]  }
  0xde   : > { %805 = vmatprep.subr.bf16.mxu0 %v3717_v25  ;;  %v3791_v25 = vld [vmem:[#allocation7 + $0x218] ss:$12 sps:$4 sm:$0xff]  }
  0xdf   : > { %1407 = vmatpush1.bf16.msra.mxu1 %v3706_v22  ;;  %v3790_v22 = vld [vmem:[#allocation7 + $0x200] ss:$12 sps:$4 sm:$0xff]  }
  0xe0   : > { %1408 = vmatprep.subr.bf16.mxu1 %v3714_v24  ;;  %v3787_v24 = vld [vmem:[#allocation7 + $0x228] ss:$12 sps:$4 sm:$0xff]  }
  0xe1   : > { %806 = vmatpush1.bf16.msra.mxu0 %v3715_v27  ;;  %v3792_v27 = vld [vmem:[#allocation7 + $0x230] ss:$12 sps:$4 sm:$0xff]  }
  0xe2   : > { %807 = vmatprep.subr.bf16.mxu0 %v3723_v30  ;;  %v3795_v30 = vld [vmem:[#allocation8 + $0x4] ss:$12 sps:$4 sm:$0xff]  }
  0xe3   : > { %1409 = vmatpush1.bf16.msra.mxu1 %v3712_v26  ;;  %v3796_v26 = vld [vmem:[#allocation8 + $0xc8] ss:$12 sps:$4 sm:$0xff]  }
  0xe4   : > { %1410 = vmatprep.subr.bf16.mxu1 %v3720_v28  ;;  %v3797_v28 = vld [vmem:[#allocation8 + $0x8] ss:$12 sps:$4 sm:$0xff]  }
  0xe5   : > { %808 = vmatpush1.bf16.msra.mxu0 %v3721_v32  ;;  %v3793_v32 = vld [vmem:[#allocation8] ss:$12 sps:$4 sm:$0xff]  }
  0xe6   : > { %3280 = vmatprep.subr.bf16.mxu0 %v3727_v35  ;;  %v3800_v35 = vld [vmem:[#allocation8 + $0x1c] ss:$12 sps:$4 sm:$0xff]  }
  0xe7   : > { %1411 = vmatpush1.bf16.msra.mxu1 %v3718_v31  ;;  %v3801_v31 = vld [vmem:[#allocation8 + $0xe0] ss:$12 sps:$4 sm:$0xff]  }
  0xe8   : > { %1412 = vmatprep.subr.bf16.mxu1 %v3726_v34  ;;  %826 = vmatmul.mubr.bf16.vlgmr.msra.gmra.mrb[0].mxu0 %v4376_v60  ;;  %v3802_v34 = vld [vmem:[#allocation8 + $0x20] ss:$12 sps:$4 sm:$0xff]  }
  0xe9   : > { %3281 = vmatpush3.bf16.msra.mxu0 %v3731_v38  ;;  %1508 = vmatprep.mubr.bf16.mxu0 %v4358_v29  ;;  %v3798_v38 = vld [vmem:[#allocation8 + $0x18] ss:$12 sps:$4 sm:$0xff]  }
  0xea   : > { %3282 = vmatprep.subr.bf16.mxu0 %v3732_v40  ;;  %v3805_v40 = vld [vmem:[#allocation8 + $0x34] ss:$12 sps:$4 sm:$0xff]  }
  0xeb   : > { %1413 = vmatpush1.bf16.msra.mxu1 %v3724_v37  ;;  %v3806_v37 = vld [vmem:[#allocation8 + $0xf8] ss:$12 sps:$4 sm:$0xff]  }
  0xec   : > { %1414 = vmatprep.subr.bf16.mxu1 %v3730_v39  ;;  %v3807_v39 = vld [vmem:[#allocation8 + $0x38] ss:$12 sps:$4 sm:$0xff]  }
  0xed   : > { %3283 = vmatpush3.bf16.msra.mxu0 %v3736_v43  ;;  %v3812_v43 = vld [vmem:[#allocation8 + $0x50] ss:$12 sps:$4 sm:$0xff]  }
  0xee   : > { %3284 = vmatprep.subr.bf16.mxu0 %v3737_v44  ;;  %v3810_v44 = vld [vmem:[#allocation8 + $0x4c] ss:$12 sps:$4 sm:$0xff]  }
  0xef   : > { %1415 = vmatpush1.bf16.msra.mxu1 %v3728_v41  ;;  %v3811_v41 = vld [vmem:[#allocation8 + $0x110] ss:$12 sps:$4 sm:$0xff]  }
  0xf0   : > { %1416 = vmatprep.subr.bf16.mxu1 %v3735_v42  ;;  %v3803_v42 = vld [vmem:[#allocation8 + $0x30] ss:$12 sps:$4 sm:$0xff]  }
  0xf1   : > { %3285 = vmatpush3.bf16.msra.mxu0 %v3741_v47  ;;  %v3817_v47 = vld [vmem:[#allocation8 + $0x68] ss:$12 sps:$4 sm:$0xff]  }
  0xf2   : > { %3286 = vmatprep.subr.bf16.mxu0 %v3742_v48  ;;  %v3815_v48 = vld [vmem:[#allocation8 + $0x64] ss:$12 sps:$4 sm:$0xff]  }
  0xf3   : > { %1417 = vmatpush1.bf16.msra.mxu1 %v3733_v45  ;;  %v3816_v45 = vld [vmem:[#allocation8 + $0x128] ss:$12 sps:$4 sm:$0xff]  }
  0xf4   : > { %1418 = vmatprep.subr.bf16.mxu1 %v3740_v46  ;;  %v3808_v46 = vld [vmem:[#allocation8 + $0x48] ss:$12 sps:$4 sm:$0xff]  }
  0xf5   : > { %3287 = vmatpush3.bf16.msra.mxu0 %v3746_v51  ;;  %v3820_v51 = vld [vmem:[#allocation8 + $0x7c] ss:$12 sps:$4 sm:$0xff]  }
  0xf6   : > { %3288 = vmatprep.subr.bf16.mxu0 %v3747_v52  ;;  %v3826_v52 = vld [vmem:[#allocation8 + $0x158] ss:$12 sps:$4 sm:$0xff]  }
  0xf7   : > { %1419 = vmatpush1.bf16.msra.mxu1 %v3738_v49  ;;  %v3821_v49 = vld [vmem:[#allocation8 + $0x140] ss:$12 sps:$4 sm:$0xff]  }
  0xf8   : > { %1420 = vmatprep.subr.bf16.mxu1 %v3745_v50  ;;  %v3813_v50 = vld [vmem:[#allocation8 + $0x60] ss:$12 sps:$4 sm:$0xff]  }
  0xf9   : > { %3289 = vmatpush3.bf16.msra.mxu0 %v3751_v54  ;;  %v3827_v54 = vld [vmem:[#allocation8 + $0x98] ss:$12 sps:$4 sm:$0xff]  }
  0xfa   : > { %3290 = vmatprep.subr.bf16.mxu0 %v3752_v56  ;;  %v3831_v56 = vld [vmem:[#allocation8 + $0x170] ss:$12 sps:$4 sm:$0xff]  }
  0xfb   : > { %1421 = vmatpush1.bf16.msra.mxu1 %v3743_v53  ;;  %v3818_v53 = vld [vmem:[#allocation8 + $0x78] ss:$12 sps:$4 sm:$0xff]  }
  0xfc   : > { %1422 = vmatprep.subr.bf16.mxu1 %v3750_v55  ;;  %v3825_v55 = vld [vmem:[#allocation8 + $0x94] ss:$12 sps:$4 sm:$0xff]  }
  0xfd   : > { %3291 = vmatpush3.bf16.msra.mxu0 %v3756_v58  ;;  %v3832_v58 = vld [vmem:[#allocation8 + $0xb0] ss:$12 sps:$4 sm:$0xff]  }
  0xfe   : > { %3292 = vmatprep.subr.bf16.mxu0 %v3757_v61  ;;  %v3828_v61 = vld [vmem:[#allocation8 + $0xa8] ss:$12 sps:$4 sm:$0xff]  }
  0xff   : > { %1423 = vmatpush1.bf16.msra.mxu1 %v3748_v57  ;;  %v3823_v57 = vld [vmem:[#allocation8 + $0x90] ss:$12 sps:$4 sm:$0xff]  }
 0x100   : > { %1424 = vmatprep.subr.bf16.mxu1 %v3755_v59  ;;  %v3830_v59 = vld [vmem:[#allocation8 + $0xac] ss:$12 sps:$4 sm:$0xff]  }
 0x101   : > { %3293 = vmatpush3.bf16.msra.mxu0 %v3761_v63  ;;  %v3835_v63 = vld [vmem:[#allocation8 + $0xc4] ss:$12 sps:$4 sm:$0xff]  }
 0x102   : > { %3294 = vmatprep.subr.bf16.mxu0 %v3762_v1  ;;  %v3840_v1 = vld [vmem:[#allocation8 + $0x1a0] ss:$12 sps:$4 sm:$0xff]  }
 0x103   : > { %1425 = vmatpush1.bf16.msra.mxu1 %v3753_v62  ;;  %v3836_v62 = vld [vmem:[#allocation8 + $0x188] ss:$12 sps:$4 sm:$0xff]  }
 0x104   : > { %1435 = vmatprep.subr.bf16.mxu1 %v3760_v0  ;;  %v3833_v0 = vld [vmem:[#allocation8 + $0xc0] ss:$12 sps:$4 sm:$0xff]  }
 0x105   : > { %3295 = vmatpush3.bf16.msra.mxu0 %v3766_v3  ;;  %v3837_v3 = vld [vmem:[#allocation8 + $0xd8] ss:$12 sps:$4 sm:$0xff]  }
 0x106   : > { %1427 = vmatmul.mubr.bf16.vlgmr.msra.gmra.mrb[8].mxu1 %v4362_v33  ;;  %3386 = vmatprep.subr.bf16.mxu0 %v4110_v36 }
 0x107   : > { %1436 = vmatpush1.bf16.msra.mxu1 %v3758_v2  ;;  %1467 = vmatprep.mubr.bf16.mxu1 %v4112_v9  ;;  %v3839_v2 = vld [vmem:[#allocation8 + $0xdc] ss:$12 sps:$4 sm:$0xff]  }
 0x108   : > { %1437 = vmatprep.subr.bf16.mxu1 %v3765_v4  ;;  %1509 = vmatmul.mubr.bf16.vlgmr.msra.gmra.mrb[4].mxu0 %v4362_v33  ;;  %v3844_v4 = vld [vmem:[#allocation8 + $0x1b8] ss:$12 sps:$4 sm:$0xff]  }
 0x109   : > { %3387 = vmatpush3.bf16.msra.mxu0 %v3770_v6  ;;  %3402 = vmatprep.mubr.msk.bf16.mxu0 %vm4111_vm0, %v4110_v36  ;;  %v3841_v6 = vld [vmem:[#allocation8 + $0xf0] ss:$12 sps:$4 sm:$0xff]  }
 0x10a   : > { %3388 = vmatprep.subr.bf16.mxu0 %v4110_v36 }
 0x10b   : > { %1438 = vmatpush1.bf16.msra.mxu1 %v3763_v5  ;;  %v3843_v5 = vld [vmem:[#allocation8 + $0xf4] ss:$12 sps:$4 sm:$0xff]  }
 0x10c   : > { %1439 = vmatprep.subr.bf16.mxu1 %v3769_v7  ;;  %v3848_v7 = vld [vmem:[#allocation8 + $0x1d0] ss:$12 sps:$4 sm:$0xff]  }
 0x10d   : > { %3389 = vmatpush3.bf16.msra.mxu0 %v3774_v10  ;;  %v3845_v10 = vld [vmem:[#allocation8 + $0x108] ss:$12 sps:$4 sm:$0xff]  }
 0x10e   : > { %3390 = vmatprep.subr.bf16.mxu0 %v4110_v36 }
 0x10f   : > { %1440 = vmatpush1.bf16.msra.mxu1 %v3767_v8  ;;  %v3847_v8 = vld [vmem:[#allocation8 + $0x10c] ss:$12 sps:$4 sm:$0xff]  }
 0x110   : > { %1441 = vmatprep.subr.bf16.mxu1 %v3773_v11  ;;  %v3852_v11 = vld [vmem:[#allocation8 + $0x1e8] ss:$12 sps:$4 sm:$0xff]  }
 0x111   : > { %3391 = vmatpush3.bf16.msra.mxu0 %v3778_v13  ;;  %v3849_v13 = vld [vmem:[#allocation8 + $0x120] ss:$12 sps:$4 sm:$0xff]  }
 0x112   : > { %3392 = vmatprep.subr.bf16.mxu0 %v4110_v36 }
 0x113   : > { %1442 = vmatpush1.bf16.msra.mxu1 %v3771_v12  ;;  %v3851_v12 = vld [vmem:[#allocation8 + $0x124] ss:$12 sps:$4 sm:$0xff]  }
 0x114   : > { %1443 = vmatprep.subr.bf16.mxu1 %v3777_v14  ;;  %v3856_v14 = vld [vmem:[#allocation8 + $0x200] ss:$12 sps:$4 sm:$0xff]  }
 0x115   : > { %3393 = vmatpush3.bf16.msra.mxu0 %v3782_v16  ;;  %v3853_v16 = vld [vmem:[#allocation8 + $0x138] ss:$12 sps:$4 sm:$0xff]  }
 0x116   : > { %3394 = vmatprep.subr.bf16.mxu0 %v4110_v36 }
 0x117   : > { %1444 = vmatpush1.bf16.msra.mxu1 %v3775_v15  ;;  %v3855_v15 = vld [vmem:[#allocation8 + $0x13c] ss:$12 sps:$4 sm:$0xff]  }
 0x118   : > { %1445 = vmatprep.subr.bf16.mxu1 %v3781_v17  ;;  %v3860_v17 = vld [vmem:[#allocation8 + $0x218] ss:$12 sps:$4 sm:$0xff]  }
 0x119   : > { %3395 = vmatpush3.bf16.msra.mxu0 %v3786_v19  ;;  %v3857_v19 = vld [vmem:[#allocation8 + $0x150] ss:$12 sps:$4 sm:$0xff]  }
 0x11a   : > { %3396 = vmatprep.subr.bf16.mxu0 %v4110_v36 }
 0x11b   : > { %1446 = vmatpush1.bf16.msra.mxu1 %v3779_v18  ;;  %v3859_v18 = vld [vmem:[#allocation8 + $0x154] ss:$12 sps:$4 sm:$0xff]  }
 0x11c   : > { %1447 = vmatprep.subr.bf16.mxu1 %v3785_v20  ;;  %v3864_v20 = vld [vmem:[#allocation8 + $0x230] ss:$12 sps:$4 sm:$0xff]  }
 0x11d   : > { %3397 = vmatpush3.bf16.msra.mxu0 %v3790_v22  ;;  %v3861_v22 = vld [vmem:[#allocation8 + $0x168] ss:$12 sps:$4 sm:$0xff]  }
 0x11e   : > { %3398 = vmatprep.subr.bf16.mxu0 %v4110_v36 }
 0x11f   : > { %1448 = vmatpush1.bf16.msra.mxu1 %v3783_v21  ;;  %v3863_v21 = vld [vmem:[#allocation8 + $0x16c] ss:$12 sps:$4 sm:$0xff]  }
 0x120   : > { %1449 = vmatprep.subr.bf16.mxu1 %v3789_v23  ;;  %v3867_v23 = vld [vmem:[#allocation8 + $0x184] ss:$12 sps:$4 sm:$0xff]  }
 0x121   : > { %3399 = vmatpush3.bf16.msra.mxu0 %v3791_v25  ;;  %v3870_v25 = vld [vmem:[#allocation8 + $0x19c] ss:$12 sps:$4 sm:$0xff]  }
 0x122   : > { %3400 = vmatprep.subr.bf16.mxu0 %v4110_v36 }
 0x123   : > { %1450 = vmatpush1.bf16.msra.mxu1 %v3787_v24  ;;  %v3865_v24 = vld [vmem:[#allocation8 + $0x180] ss:$12 sps:$4 sm:$0xff]  }
 0x124   : > { %3311 = vmatprep.subr.bf16.mxu1 %v3796_v26  ;;  %v3868_v26 = vld [vmem:[#allocation8 + $0x198] ss:$12 sps:$4 sm:$0xff]  }
 0x125   : > { %3401 = vmatpush3.bf16.msra.mxu0 %v3792_v27  ;;  %v3873_v27 = vld [vmem:[#allocation8 + $0x1b4] ss:$12 sps:$4 sm:$0xff]  }
 0x126   : > { %1468 = vmatmul.mubr.bf16.vlgmr.msra.gmra.mrb[8].mxu1 %v4376_v60  ;;  %2036 = vmatprep.subr.bf16.mxu0 %v3795_v30  ;;  %v3876_v30 = vld [vmem:[#allocation8 + $0x1cc] ss:$12 sps:$4 sm:$0xff]  }
 0x127   : > { %3312 = vmatpush3.bf16.msra.mxu1 %v3797_v28  ;;  %2150 = vmatprep.mubr.bf16.mxu1 %v4358_v29  ;;  %v3871_v28 = vld [vmem:[#allocation8 + $0x1b0] ss:$12 sps:$4 sm:$0xff]  }
 0x128   : > { %3313 = vmatprep.subr.bf16.mxu1 %v3801_v31  ;;  %3403 = vmatmul.mubr.bf16.vlgmr.msra.gmra.mrb[8].mxu0 %v4376_v60  ;;  %v3879_v31 = vld [vmem:[#allocation8 + $0x1e4] ss:$12 sps:$4 sm:$0xff]  }
 0x129   : > { %2037 = vmatpush1.bf16.msra.mxu0 %v3793_v32  ;;  %2068 = vmatprep.mubr.bf16.mxu0 %v4358_v29  ;;  %v3822_v29 = vld [vmem:[#allocation8 + $0x80] ss:$12 sps:$4 sm:$0xff]  }
 0x12a   : > { %2038 = vmatprep.subr.bf16.mxu0 %v3800_v35  ;;  %v3877_v32 = vld [vmem:[#allocation8 + $0x1e0] ss:$12 sps:$4 sm:$0xff]  }
 0x12b   : > { %3314 = vmatpush3.bf16.msra.mxu1 %v3802_v34  ;;  %v3882_v34 = vld [vmem:[#allocation8 + $0x1fc] ss:$12 sps:$4 sm:$0xff]  }
 0x12c   : > { %3315 = vmatprep.subr.bf16.mxu1 %v3806_v37 }
 0x12d   : > { %2039 = vmatpush1.bf16.msra.mxu0 %v3798_v38 }
 0x12e   : > { %2040 = vmatprep.subr.bf16.mxu0 %v3805_v40  ;;  %v3885_v40 = vld [vmem:[#allocation8 + $0x214] ss:$12 sps:$4 sm:$0xff]  }
 0x12f   : > { %3316 = vmatpush3.bf16.msra.mxu1 %v3807_v39 }
 0x130   : > { %3317 = vmatprep.subr.bf16.mxu1 %v3811_v41  ;;  %v3883_v41 = vld [vmem:[#allocation8 + $0x210] ss:$12 sps:$4 sm:$0xff]  }
 0x131   : > { %2041 = vmatpush1.bf16.msra.mxu0 %v3803_v42  ;;  %v3888_v42 = vld [vmem:[#allocation8 + $0x22c] ss:$12 sps:$4 sm:$0xff]  }
 0x132   : > { %2042 = vmatprep.subr.bf16.mxu0 %v3810_v44  ;;  %v3913_v44 = vld [vmem:[%s4343_s11 + $0x8] ss:$0 sps:$4 sm:$0xff]  }
 0x133   : > { %3318 = vmatpush3.bf16.msra.mxu1 %v3812_v43  ;;  %v3886_v43 = vld [vmem:[#allocation8 + $0x228] ss:$12 sps:$4 sm:$0xff]  }
 0x134   : > { %3319 = vmatprep.subr.bf16.mxu1 %v3816_v45 }
 0x135   : > { %2043 = vmatpush1.bf16.msra.mxu0 %v3808_v46 }
 0x136   : > { %2044 = vmatprep.subr.bf16.mxu0 %v3815_v48 }
 0x137   : > { %3320 = vmatpush3.bf16.msra.mxu1 %v3817_v47 }
 0x138   : > { %3321 = vmatprep.subr.bf16.mxu1 %v3821_v49 }
 0x139   : > { %2045 = vmatpush1.bf16.msra.mxu0 %v3813_v50 }
 0x13a   : > { %2046 = vmatprep.subr.bf16.mxu0 %v3820_v51 }
 0x13b   : > { %3322 = vmatpush3.bf16.msra.mxu1 %v3822_v29 }
 0x13c   : > { %3323 = vmatprep.subr.bf16.mxu1 %v3826_v52 }
 0x13d   : > { %2047 = vmatpush1.bf16.msra.mxu0 %v3818_v53 }
 0x13e   : > { %2048 = vmatprep.subr.bf16.mxu0 %v3825_v55 }
 0x13f   : > { %3324 = vmatpush3.bf16.msra.mxu1 %v3827_v54 }
 0x140   : > { %3325 = vmatprep.subr.bf16.mxu1 %v3831_v56 }
 0x141   : > { %2049 = vmatpush1.bf16.msra.mxu0 %v3823_v57 }
 0x142   : > { %2050 = vmatprep.subr.bf16.mxu0 %v3830_v59 }
 0x143   : > { %3326 = vmatpush3.bf16.msra.mxu1 %v3832_v58 }
 0x144   : > { %3406 = vmatprep.subr.bf16.mxu1 %v4110_v36 }
 0x145   : > { %2051 = vmatpush1.bf16.msra.mxu0 %v3828_v61 }
 0x146   : > { %2151 = vmatmul.mubr.bf16.vlgmr.msra.gmra.mrb[12].mxu1 %v4362_v33  ;;  %2052 = vmatprep.subr.bf16.mxu0 %v3835_v63 }
 0x147   : > { %3407 = vmatpush3.bf16.msra.mxu1 %v3836_v62  ;;  %3422 = vmatprep.mubr.msk.bf16.mxu1 %vm4111_vm0, %v4110_v36 }
 0x148   : > { %3408 = vmatprep.subr.bf16.mxu1 %v4110_v36 }
 0x149   : > { %2053 = vmatpush1.bf16.msra.mxu0 %v3833_v0 }
 0x14a   : > { %2054 = vmatprep.subr.bf16.mxu0 %v3839_v2 }
 0x14b   : > { %3409 = vmatpush3.bf16.msra.mxu1 %v3840_v1 }
 0x14c   : > { %3410 = vmatprep.subr.bf16.mxu1 %v4110_v36 }
 0x14d   : > { %2055 = vmatpush1.bf16.msra.mxu0 %v3837_v3 }
 0x14e   : > { %2056 = vmatprep.subr.bf16.mxu0 %v3843_v5 }
 0x14f   : > { %3411 = vmatpush3.bf16.msra.mxu1 %v3844_v4 }
 0x150   : > { %3412 = vmatprep.subr.bf16.mxu1 %v4110_v36 }
 0x151   : > { %2057 = vmatpush1.bf16.msra.mxu0 %v3841_v6 }
 0x152   : > { %2058 = vmatprep.subr.bf16.mxu0 %v3847_v8 }
 0x153   : > { %3413 = vmatpush3.bf16.msra.mxu1 %v3848_v7 }
 0x154   : > { %3414 = vmatprep.subr.bf16.mxu1 %v4110_v36 }
 0x155   : > { %2059 = vmatpush1.bf16.msra.mxu0 %v3845_v10 }
 0x156   : > { %2060 = vmatprep.subr.bf16.mxu0 %v3851_v12 }
 0x157   : > { %3415 = vmatpush3.bf16.msra.mxu1 %v3852_v11 }
 0x158   : > { %3416 = vmatprep.subr.bf16.mxu1 %v4110_v36 }
 0x159   : > { %2061 = vmatpush1.bf16.msra.mxu0 %v3849_v13 }
 0x15a   : > { %2062 = vmatprep.subr.bf16.mxu0 %v3855_v15 }
 0x15b   : > { %3417 = vmatpush3.bf16.msra.mxu1 %v3856_v14 }
 0x15c   : > { %3418 = vmatprep.subr.bf16.mxu1 %v4110_v36 }
 0x15d   : > { %2063 = vmatpush1.bf16.msra.mxu0 %v3853_v16 }
 0x15e   : > { %2064 = vmatprep.subr.bf16.mxu0 %v3859_v18 }
 0x15f   : > { %3419 = vmatpush3.bf16.msra.mxu1 %v3860_v17 }
 0x160   : > { %3420 = vmatprep.subr.bf16.mxu1 %v4110_v36 }
 0x161   : > { %2065 = vmatpush1.bf16.msra.mxu0 %v3857_v19 }
 0x162   : > { %2066 = vmatprep.subr.bf16.mxu0 %v3863_v21 }
 0x163   : > { %3421 = vmatpush3.bf16.msra.mxu1 %v3864_v20 }
 0x164   : > { %3426 = vmatprep.subr.bf16.mxu1 %v4110_v36 }
 0x165   : > { %2067 = vmatpush1.bf16.msra.mxu0 %v3861_v22 }
 0x166   : > { %3423 = vmatmul.mubr.bf16.vlgmr.msra.gmra.mrb[16].mxu1 %v4376_v60  ;;  %2077 = vmatprep.subr.bf16.mxu0 %v3867_v23  ;;  %v3874_v60 = vld [vmem:[#allocation8 + $0x1c8] ss:$12 sps:$4 sm:$0xff]  }
 0x167   : > { %3428 = vmatprep.mubr.msk.bf16.mxu1 %vm4111_vm0, %v4110_v36 }
 0x168   : > { %2069 = vmatmul.mubr.bf16.vlgmr.msra.gmra.mrb[12].mxu0 %v4362_v33 }
 0x169   : > { %2078 = vmatpush1.bf16.msra.mxu0 %v3865_v24  ;;  %2109 = vmatprep.mubr.bf16.mxu0 %v4112_v9  ;;  %v3880_v9 = vld [vmem:[#allocation8 + $0x1f8] ss:$12 sps:$4 sm:$0xff]  }
 0x16a   : > { %2079 = vmatprep.subr.bf16.mxu0 %v3870_v25 }
 0x16d   : > { %2080 = vmatpush1.bf16.msra.mxu0 %v3868_v26 }
 0x16e   : > { %2081 = vmatprep.subr.bf16.mxu0 %v3873_v27 }
 0x171   : > { %2082 = vmatpush1.bf16.msra.mxu0 %v3871_v28 }
 0x172   : > { %2083 = vmatprep.subr.bf16.mxu0 %v3876_v30 }
 0x175   : > { %2084 = vmatpush1.bf16.msra.mxu0 %v3874_v60 }
 0x176   : > { %2085 = vmatprep.subr.bf16.mxu0 %v3879_v31 }
 0x179   : > { %v3265_v35 = vpop.f32.mrb[0].mxu1  ;;  %2086 = vmatpush1.bf16.msra.mxu0 %v3877_v32 }
 0x17a   : > { %v3266_v33 = vpop.f32.mrb[1].mxu1  ;;  %2087 = vmatprep.subr.bf16.mxu0 %v3882_v34 }
 0x17b   : > { %v3267_v37 = vadd.f32 %v3266_v33, %v3265_v35  ;;  %v3268_v38 = vpop.f32.mrb[2].mxu1 }
 0x17c   : > { %v3269_v39 = vpop.f32.mrb[3].mxu1  ;;  %v2198_v38 = vlaneseq }
 0x17d   : > { %2088 = vmatpush1.bf16.msra.mxu0 %v3880_v9 }
 0x17e   : > { %2089 = vmatprep.subr.bf16.mxu0 %v3885_v40  ;;  %v2199_v9 = vshrl.u32 %v2198_v38, 7  ;;  %v2201_v39 = vand.u32 127, %v2198_v38 }
 0x180   : > { %vm4463_vm3 = vcmp.le.s32.totalorder %v2201_v39, %v2199_v9 }
 0x181   : > { %2090 = vmatpush1.bf16.msra.mxu0 %v3883_v41 }
 0x182   : > { %2091 = vmatprep.subr.bf16.mxu0 %v3888_v42 }
 0x185   : > { %2092 = vmatpush1.bf16.msra.mxu0 %v3886_v43 }
 0x186   : > { %3450 = vmatprep.subr.bf16.mxu0 %v4110_v36 }
 0x188   : > { %2110 = vmatmul.mubr.bf16.vlgmr.msra.gmra.mrb[12].mxu0 %v3913_v44 }
 0x189   : > { %3452 = vmatprep.mubr.msk.bf16.mxu0 %vm4111_vm0, %v4110_v36 }
 0x199   : > { %v908_v45 = vpop.f32.mrb[4].mxu1 }
 0x19a   : > { %v909_v46 = vadd.f32 %v3267_v37, %v908_v45  ;;  %v3384_v47 = vpop.f32.mrb[5].mxu1 }
 0x19b   : > { %v911_v48 = vpop.f32.mrb[6].mxu1 }
 0x19c   : > { %v3385_v49 = vpop.f32.mrb[7].mxu1  ;;  %v2650_v12 = vpack.c.bf16 %v909_v46, %v909_v46 }
 0x1bb   : > { %v827_v50 = vpop.f32.mrb[0].mxu0 }
 0x1bc   : > { %v2203_v29 = vpack.c.bf16 %v827_v50, %v827_v50  ;;  %v829_v51 = vpop.f32.mrb[1].mxu0 }
 0x1bd   : > { %v831_v52 = vpop.f32.mrb[2].mxu0  ;;  %v2428_v7 = vpack.c.bf16 %v829_v51, %v829_v51 }
 0x1be   : > { %v832_v53 = vpop.f32.mrb[3].mxu0  ;;  %2315 = vrot.lane.b32.xlu1 %v2203_v29, %s4113_s21 }
 0x1db   : > { %v3296_v54 = vpop.f32.mrb[4].mxu0 }
 0x1dc   : > { %v3297_v55 = vpop.f32.mrb[5].mxu0 }
 0x1dd   : > { %v3298_v56 = vadd.f32 %v3297_v55, %v3296_v54  ;;  %v3299_v57 = vpop.f32.mrb[6].mxu0 }
 0x1de   : > { %v3300_v58 = vpop.f32.mrb[7].mxu0 }
 0x1f9   : > { %v1469_v59 = vpop.f32.mrb[8].mxu1 }
 0x1fa   : > { %v4423_v61 = vpack.c.bf16 %v1469_v59, %v1469_v59  ;;  %v1471_v62 = vpop.f32.mrb[9].mxu1 }
 0x1fb   : > { %v2429_v63 = vpack.c.bf16 %v1471_v62, %v1471_v62  ;;  %v1473_v0 = vpop.f32.mrb[10].mxu1  ;;  %v1550_v4 = vpop.f32.mrb[8].mxu0 }
 0x1fc   : > { %v2211_v1 = vsel %vm2206_vm1, %v4423_v61, 0  ;;  %v1474_v2 = vpop.f32.mrb[11].mxu1  ;;  %v1551_v5 = vadd.f32 %v3298_v56, %v1550_v4  ;;  %v3404_v6 = vpop.f32.mrb[9].mxu0 }
 0x1fd   : > { %v2435_v3 = vsel %vm2206_vm1, %v2429_v63, 0  ;;  %3427 = vmatpush3.bf16.xpose.msra.mxu1 %v2211_v1  ;;  %2540 = vrot.lane.b32.xlu1 %v2429_v63, %s4113_s21  ;;  %v1553_v8 = vpop.f32.mrb[10].mxu0 }
 0x1fe   : > { %3451 = vmatpush3.bf16.xpose.msra.mxu0 %v2435_v3  ;;  %3432 = vmatprep.subr.bf16.mxu1 %v4110_v36  ;;  %v3405_v10 = vpop.f32.mrb[11].mxu0  ;;  %v2651_v11 = vpack.c.bf16 %v1551_v5, %v1551_v5 }
 0x1ff   : > { %3462 = vmatprep.subr.bf16.mxu0 %v4110_v36 }
 0x200   : > { %v2657_v32 = vsel %vm2206_vm1, %v2651_v11, 0 }
 0x201   : > { %2537 = vrot.lane.b32.xlu1 %v2428_v7, %s4113_s21 }
 0x204   : > { %3429 = vmatmul.mubr.msk.bf16.vlgmr.msra.gmra.mrb[20].mxu1 %vm2206_vm1, %v2203_v29 }
 0x205   : > { %3453 = vmatmul.mubr.msk.bf16.vlgmr.msra.gmra.mrb[16].mxu0 %vm2206_vm1, %v2428_v7  ;;  %2762 = vrot.lane.b32.xlu1 %v2651_v11, %s4113_s21 }
 0x206   : > { %3464 = vmatprep.mubr.msk.bf16.mxu0 %vm4111_vm0, %v4110_v36  ;;  %3434 = vmatprep.mubr.msk.bf16.mxu1 %vm4111_vm0, %v4110_v36 }
 0x209   : > { %2759 = vrot.lane.b32.xlu1 %v2650_v12, %s4113_s21 }
 0x219   : > { %v3327_v13 = vpop.f32.mrb[12].mxu1 }
 0x21a   : > { %v3328_v14 = vpop.f32.mrb[13].mxu1 }
 0x21b   : > { %v3329_v15 = vadd.f32 %v3328_v14, %v3327_v13  ;;  %v3330_v16 = vpop.f32.mrb[14].mxu1 }
 0x21c   : > { %v3331_v17 = vpop.f32.mrb[15].mxu1 }
 0x230   : > { %v4449_v30 = vpop.permute.xlu1 %2315 }
 0x239   : > { %v2192_v18 = vpop.f32.mrb[16].mxu1 }
 0x23a   : > { %v4440_v19 = vadd.f32 %v3329_v15, %v2192_v18  ;;  %v3424_v20 = vpop.f32.mrb[17].mxu1 }
 0x23b   : > { %v2195_v21 = vpop.f32.mrb[18].mxu1 }
 0x23c   : > { %v3425_v22 = vpop.f32.mrb[19].mxu1 }
 0x25b   : > { %v2111_v23 = vpop.f32.mrb[12].mxu0 }
 0x25c   : > { %v4442_v24 = vpack.c.bf16 %v2111_v23, %v2111_v23  ;;  %v4444_v25 = vpop.f32.mrb[13].mxu0 }
 0x25d   : > { %v2115_v26 = vpop.f32.mrb[14].mxu0  ;;  %v4489_v11 = vpack.c.bf16 %v4444_v25, %v4444_v25 }
 0x25e   : > { %v2270_v27 = vsel %vm2268_vm2, %v4442_v24, 0  ;;  %v2116_v28 = vpop.f32.mrb[15].mxu0 }
 0x25f   : > { %3433 = vmatpush3.bf16.msra.mxu1 %v2270_v27 }
 0x260   : > { %3438 = vmatprep.subr.bf16.mxu1 %v4110_v36 }
 0x26f   : > { %v2541_v60 = vpop.permute.xlu1 %2540 }
 0x270   : > { %v2546_v31 = vsel %vm2206_vm1, %v2541_v60, 0 }
 0x271   : > { %3463 = vmatpush3.bf16.xpose.msra.mxu0 %v2546_v31 }
 0x272   : > { %3474 = vmatprep.subr.bf16.mxu0 %v4110_v36 }
 0x273   : > { %v2538_v34 = vpop.permute.xlu1 %2537 }
 0x277   : > { %v2763_v35 = vpop.permute.xlu1 %2762 }
 0x278   : > { %3465 = vmatmul.mubr.msk.bf16.vlgmr.msra.gmra.mrb[20].mxu0 %vm2206_vm1, %v2538_v34  ;;  %v2768_v33 = vsel %vm2206_vm1, %v2763_v35, 0 }
 0x279   : > { %3475 = vmatpush3.bf16.xpose.msra.mxu0 %v2657_v32  ;;  %3476 = vmatprep.mubr.msk.bf16.mxu0 %vm4111_vm0, %v4110_v36 }
 0x27a   : > { %3486 = vmatprep.subr.bf16.mxu0 %v4110_v36 }
 0x27b   : > { %v2760_v37 = vpop.permute.xlu1 %2759 }
 0x280   : > { %3477 = vmatmul.mubr.msk.bf16.vlgmr.msra.gmra.mrb[24].mxu0 %vm2206_vm1, %v2650_v12 }
 0x281   : > { %3487 = vmatpush3.bf16.xpose.msra.mxu0 %v2768_v33  ;;  %3488 = vmatprep.mubr.msk.bf16.mxu0 %vm4111_vm0, %v4110_v36 }
 0x288   : > { %3489 = vmatmul.mubr.msk.bf16.vlgmr.msra.gmra.mrb[28].mxu0 %vm2206_vm1, %v2760_v37 }
 0x2d7   : > { %v2247_v41 = vpop.f32.mrb[20].mxu1 }
 0x2d8   : > { %v2253_v42 = vsel %vm4463_vm3, %v2247_v41, -inf  ;;  %v3430_v43 = vpop.f32.mrb[21].mxu1  ;;  %v2471_v44 = vpop.f32.mrb[16].mxu0  ;;  %v2652_v41 = vpack.c.bf16 %v4440_v19, %v4440_v19 }
 0x2d9   : > { %v2250_v45 = vpop.f32.mrb[22].mxu1  ;;  %v3454_v46 = vpop.f32.mrb[17].mxu0  ;;  %v2255_v47 = vsel %vm2254_vm4, %v2253_v42, -inf  ;;  %v4474_v29 = vsel %vm4463_vm3, %v2471_v44, -inf }
 0x2da   : > { %2256 = vmax.xlane.f32.xlu0 %v2255_v47  ;;  %v3431_v48 = vpop.f32.mrb[23].mxu1  ;;  %v2474_v49 = vpop.f32.mrb[18].mxu0  ;;  %v2478_v51 = vsel %vm2254_vm4, %v4474_v29, -inf }
 0x2db   : > { %v3455_v50 = vpop.f32.mrb[19].mxu0 }
 0x2f0   : > { %2318 = vrot.lane.b32.xlu0 %v4423_v61, %s4113_s21 }
 0x30f   : > { %2479 = vmax.xlane.f32.xlu0 %v2478_v51 }
 0x34b   : > { %v2582_v52 = vpop.f32.mrb[20].mxu0 }
 0x34c   : > { %v2588_v53 = vsel %vm4463_vm3, %v2582_v52, -inf  ;;  %v3466_v54 = vpop.f32.mrb[21].mxu0 }
 0x34d   : > { %v2585_v55 = vpop.f32.mrb[22].mxu0  ;;  %v2589_v56 = vsel %vm2254_vm4, %v2588_v53, -inf }
 0x34e   : > { %v3467_v57 = vpop.f32.mrb[23].mxu0  ;;  %2590 = vmax.xlane.f32.xlu1 %v2589_v56 }
 0x353   : > { %v2693_v58 = vpop.f32.mrb[24].mxu0 }
 0x354   : > { %v2699_v59 = vsel %vm4463_vm3, %v2693_v58, -inf  ;;  %v3478_v61 = vpop.f32.mrb[25].mxu0 }
 0x355   : > { %v2696_v62 = vpop.f32.mrb[26].mxu0  ;;  %v2700_v63 = vsel %vm2254_vm4, %v2699_v59, -inf  ;;  %v2714_v61 = vsel %vm2268_vm2, %v2652_v41, 0 }
 0x356   : > { %2701 = vmax.xlane.f32.xlu0 %v2700_v63  ;;  %v3479_v0 = vpop.f32.mrb[27].mxu0 }
 0x35b   : > { %v2804_v1 = vpop.f32.mrb[28].mxu0 }
 0x35c   : > { %v2810_v2 = vsel %vm4463_vm3, %v2804_v1, -inf  ;;  %v3490_v3 = vpop.f32.mrb[29].mxu0 }
 0x35d   : > { %v2807_v4 = vpop.f32.mrb[30].mxu0  ;;  %v2811_v5 = vsel %vm2254_vm4, %v2810_v2, -inf }
 0x35e   : > { %2812 = vmax.xlane.f32.xlu0 %v2811_v5  ;;  %v3491_v6 = vpop.f32.mrb[31].mxu0 }
 0x367   : > { %v2257_v7 = vpop.xlane.xlu0 %2256 }
 0x368   : > { %v2258_v8 = vsub.f32 %v2253_v42, %v2257_v7 }
 0x36a   : > { %v2259_v10 = vmul.f32 1.442695, %v2258_v8 }
 0x36b   : > { %v2319_v13 = vpop.permute.xlu0 %2318 }
 0x36c   : > { %3889 = vpow2.f32 %v2259_v10  ;;  %v2324_v15 = vsel %vm2206_vm1, %v2319_v13, 0 }
 0x374   : > { %2600 = vrot.lane.b32.xlu0 %v4489_v11, %s4113_s21 }
 0x376   : > { %v3890_v12 = vpop.eup %3889 }
 0x377   : > { %v2264_v14 = vpack.c.bf16 %v3890_v12, %v3890_v12  ;;  %v2261_v27 = vsel %vm2254_vm4, %v3890_v12, 0.0 }
 0x379   : > { %3435 = vmatmul.mubr.msk.bf16.vlgmr.msra.gmra.mrb[24].mxu1 %vm2254_vm4, %v2264_v14 }
 0x37a   : > { %3439 = vmatpush3.bf16.xpose.msra.mxu1 %v2324_v15  ;;  %3440 = vmatprep.mubr.msk.bf16.mxu1 %vm4111_vm0, %v4110_v36 }
 0x37b   : > { %3444 = vmatprep.subr.bf16.mxu1 %v4110_v36 }
 0x381   : > { %3441 = vmatmul.mubr.msk.bf16.vlgmr.msra.gmra.mrb[28].mxu1 %vm2206_vm1, %v4449_v30 }
 0x382   : > { %3446 = vmatprep.mubr.msk.bf16.mxu1 %vm4111_vm0, %v4110_v36 }
 0x39c   : > { %v2480_v20 = vpop.xlane.xlu0 %2479 }
 0x39d   : > { %v2481_v40 = vsub.f32 %v4474_v29, %v2480_v20  ;;  %v2492_v29 = vsel %vm2268_vm2, %v4489_v11, 0 }
 0x39f   : > { %v2482_v50 = vmul.f32 1.442695, %v2481_v40 }
 0x3db   : > { %v2591_v16 = vpop.xlane.xlu1 %2590 }
 0x3dc   : > { %v2592_v17 = vsub.f32 %v2588_v53, %v2591_v16 }
 0x3de   : > { %v2593_v18 = vmul.f32 1.442695, %v2592_v17 }
 0x3e0   : > { %3891 = vpow2.f32 %v2593_v18 }
 0x3e3   : > { %v2702_v21 = vpop.xlane.xlu0 %2701 }
 0x3e4   : > { %v2703_v22 = vsub.f32 %v2699_v59, %v2702_v21 }
 0x3e6   : > { %v2704_v23 = vmul.f32 1.442695, %v2703_v22 }
 0x3e8   : > { %3893 = vpow2.f32 %v2704_v23 }
 0x3ea   : > { %v3892_v25 = vpop.eup %3891 }
 0x3eb   : > { %v2595_v26 = vsel %vm2254_vm4, %v3892_v25, 0.0  ;;  %v2813_v42 = vpop.xlane.xlu0 %2812  ;;  %v2598_v59 = vpack.c.bf16 %v3892_v25, %v3892_v25 }
 0x3ec   : > { %2596 = vadd.xlane.f32.xlu0 %v2595_v26  ;;  %v2814_v43 = vsub.f32 %v2810_v2, %v2813_v42 }
 0x3ee   : > { %v2815_v46 = vmul.f32 1.442695, %v2814_v43 }
 0x3ef   : > { %v2601_v55 = vpop.permute.xlu0 %2600 }
 0x3f0   : > { %2262 = vadd.xlane.f32.xlu0 %v2261_v27  ;;  %v2606_v58 = vsel %vm2268_vm2, %v2601_v55, 0 }
 0x3f2   : > { %v4504_v28 = vpop.eup %3893 }
 0x3f3   : > { %v2706_v30 = vsel %vm2254_vm4, %v4504_v28, 0.0  ;;  %v2709_v63 = vpack.c.bf16 %v4504_v28, %v4504_v28 }
 0x3f4   : > { %2707 = vadd.xlane.f32.xlu0 %v2706_v30 }
 0x44c   : > { %v4508_v60 = vpop.f32.mrb[24].mxu1 }
 0x44d   : > { %v3436_v31 = vpop.f32.mrb[25].mxu1 }
 0x44e   : > { %v2309_v32 = vpop.f32.mrb[26].mxu1 }
 0x44f   : > { %v3437_v34 = vpop.f32.mrb[27].mxu1 }
 0x454   : > { %v2360_v35 = vpop.f32.mrb[28].mxu1 }
 0x455   : > { %v2366_v33 = vsel %vm4463_vm3, %v2360_v35, -inf  ;;  %v3442_v37 = vpop.f32.mrb[29].mxu1 }
 0x456   : > { %v2363_v38 = vpop.f32.mrb[30].mxu1  ;;  %v2367_v9 = vsel %vm2254_vm4, %v2366_v33, -inf }
 0x457   : > { %v3443_v39 = vpop.f32.mrb[31].mxu1  ;;  %2368 = vmax.xlane.f32.xlu1 %v2367_v9 }
 0x468   : > { %2378 = vrot.lane.b32.xlu1 %v4442_v24, %s4113_s21 }
 0x46c   : > { %2822 = vrot.lane.b32.xlu1 %v2652_v41, %s4113_s21 }
 0x479   : > { %v2597_v8 = vpop.xlane.xlu0 %2596 }
 0x47d   : > { %v2263_v35 = vpop.xlane.xlu0 %2262 }
 0x481   : > { %v2708_v41 = vpop.xlane.xlu0 %2707 }
 0x4e4   : > { %v2369_v44 = vpop.xlane.xlu1 %2368 }
 0x4e5   : > { %v2370_v45 = vsub.f32 %v2366_v33, %v2369_v44 }
 0x4e7   : > { %v2371_v47 = vmul.f32 1.442695, %v2370_v45 }
 0x4e8   : > { %v2379_v48 = vpop.permute.xlu1 %2378 }
 0x4e9   : > { %3895 = vpow2.f32 %v2371_v47  ;;  %v2384_v49 = vsel %vm2268_vm2, %v2379_v48, 0 }
 0x4ea   : > { %3445 = vmatpush3.bf16.msra.mxu1 %v2384_v49  ;;  %3897 = vpow2.f32 %v2815_v46 }
 0x4eb   : > { %3456 = vmatprep.subr.bf16.mxu1 %v4110_v36  ;;  %3899 = vpow2.f32 %v2482_v50 }
 0x4ec   : > { %v2823_v62 = vpop.permute.xlu1 %2822 }
 0x4ed   : > { %v2828_v0 = vsel %vm2268_vm2, %v2823_v62, 0 }
 0x4f3   : > { %v3896_v19 = vpop.eup %3895 }
 0x4f4   : > { %v2373_v24 = vsel %vm2254_vm4, %v3896_v19, 0.0  ;;  %v2376_v51 = vpack.c.bf16 %v3896_v19, %v3896_v19  ;;  %v3898_v52 = vpop.eup %3897 }
 0x4f5   : > { %2374 = vadd.xlane.f32.xlu1 %v2373_v24  ;;  %v2817_v53 = vsel %vm2254_vm4, %v3898_v52, 0.0  ;;  %v3900_v54 = vpop.eup %3899  ;;  %v2820_v1 = vpack.c.bf16 %v3898_v52, %v3898_v52 }
 0x4f6   : > { %3447 = vmatmul.mubr.msk.bf16.vlgmr.msra.gmra.mrb[32].mxu1 %vm2254_vm4, %v2376_v51  ;;  %v2484_v56 = vsel %vm2254_vm4, %v3900_v54, 0.0  ;;  %v2487_v57 = vpack.c.bf16 %v3900_v54, %v3900_v54 }
 0x4f7   : > { %3457 = vmatpush3.bf16.msra.mxu1 %v2492_v29  ;;  %3458 = vmatprep.mubr.msk.bf16.mxu1 %vm4111_vm0, %v4110_v36 }
 0x4f8   : > { %3468 = vmatprep.subr.bf16.mxu1 %v4110_v36 }
 0x4f9   : > { %2818 = vadd.xlane.f32.xlu1 %v2817_v53 }
 0x4fd   : > { %2485 = vadd.xlane.f32.xlu1 %v2484_v56 }
 0x4fe   : > { %3459 = vmatmul.mubr.msk.bf16.vlgmr.msra.gmra.mrb[36].mxu1 %vm2254_vm4, %v2487_v57 }
 0x4ff   : > { %3469 = vmatpush3.bf16.msra.mxu1 %v2606_v58  ;;  %3470 = vmatprep.mubr.msk.bf16.mxu1 %vm4111_vm0, %v4110_v36 }
 0x500   : > { %3480 = vmatprep.subr.bf16.mxu1 %v4110_v36 }
 0x506   : > { %3471 = vmatmul.mubr.msk.bf16.vlgmr.msra.gmra.mrb[40].mxu1 %vm2254_vm4, %v2598_v59 }
 0x507   : > { %3481 = vmatpush3.bf16.msra.mxu1 %v2714_v61  ;;  %3482 = vmatprep.mubr.msk.bf16.mxu1 %vm4111_vm0, %v4110_v36 }
 0x508   : > { %3492 = vmatprep.subr.bf16.mxu1 %v4110_v36 }
 0x50e   : > { %3483 = vmatmul.mubr.msk.bf16.vlgmr.msra.gmra.mrb[44].mxu1 %vm2254_vm4, %v2709_v63 }
 0x50f   : > { %3493 = vmatpush3.bf16.msra.mxu1 %v2828_v0  ;;  %3494 = vmatprep.mubr.msk.bf16.mxu1 %vm4111_vm0, %v4110_v36 }
 0x516   : > { %3495 = vmatmul.mubr.msk.bf16.vlgmr.msra.gmra.mrb[48].mxu1 %vm2254_vm4, %v2820_v1 }
 0x582   : > { %v2375_v2 = vpop.xlane.xlu1 %2374 }
 0x583   : > { %3901 = vrcp.f32 %v2375_v2 }
 0x584   : > { %3903 = vrcp.f32 %v2597_v8 }
 0x586   : > { %v2819_v20 = vpop.xlane.xlu1 %2818 }
 0x587   : > { %3905 = vrcp.f32 %v2819_v20 }
 0x588   : > { %3907 = vrcp.f32 %v2263_v35 }
 0x58a   : > { %v2486_v37 = vpop.xlane.xlu1 %2485 }
 0x58b   : > { %3909 = vrcp.f32 %v2486_v37 }
 0x58c   : > { %3911 = vrcp.f32 %v2708_v41 }
 0x58d   : > { %v3902_v3 = vpop.eup %3901 }
 0x58e   : > { %v3904_v36 = vpop.eup %3903 }
 0x591   : > { %v3906_v27 = vpop.eup %3905 }
 0x592   : > { %v3908_v33 = vpop.eup %3907 }
 0x593   : > { %v2313_v38 = vmul.f32 %v3908_v33, %v4508_v60 }
 0x595   : > { %v3910_v42 = vpop.eup %3909 }
 0x596   : > { %v3912_v40 = vpop.eup %3911 }
 0x5c9   : > { %v2420_v4 = vpop.f32.mrb[32].mxu1 }
 0x5ca   : > { %v2427_v5 = vmul.f32 %v3902_v3, %v2420_v4  ;;  %v3448_v6 = vpop.f32.mrb[33].mxu1 }
 0x5cb   : > { %v2423_v7 = vpop.f32.mrb[34].mxu1 }
 0x5cc   : > { %v3449_v10 = vpop.f32.mrb[35].mxu1  ;;  %2873 = vrot.lane.b32.xlu1 %v2427_v5, %s4113_s21 }
 0x5d1   : > { %v2528_v11 = vpop.f32.mrb[36].mxu1 }
 0x5d2   : > { %v3460_v12 = vpop.f32.mrb[37].mxu1  ;;  %v2535_v43 = vmul.f32 %v3910_v42, %v2528_v11 }
 0x5d3   : > { %v2531_v13 = vpop.f32.mrb[38].mxu1 }
 0x5d4   : > { %v3461_v14 = vpop.f32.mrb[39].mxu1 }
 0x5d9   : > { %v2642_v15 = vpop.f32.mrb[40].mxu1 }
 0x5da   : > { %v2649_v16 = vmul.f32 %v3904_v36, %v2642_v15  ;;  %v3472_v17 = vpop.f32.mrb[41].mxu1 }
 0x5db   : > { %v2645_v18 = vpop.f32.mrb[42].mxu1 }
 0x5dc   : > { %v3473_v21 = vpop.f32.mrb[43].mxu1  ;;  %2877 = vrot.lane.b32.xlu0 %v2649_v16, %s4113_s21 }
 0x5e1   : > { %v2750_v22 = vpop.f32.mrb[44].mxu1 }
 0x5e2   : > { %v3484_v23 = vpop.f32.mrb[45].mxu1  ;;  %v2757_v60 = vmul.f32 %v3912_v40, %v2750_v22 }
 0x5e3   : > { %v2753_v25 = vpop.f32.mrb[46].mxu1 }
 0x5e4   : > { %v3485_v26 = vpop.f32.mrb[47].mxu1 }
 0x5e9   : > { %v2864_v28 = vpop.f32.mrb[48].mxu1 }
 0x5ea   : > { %v2871_v30 = vmul.f32 %v3906_v27, %v2864_v28  ;;  %v3496_v31 = vpop.f32.mrb[49].mxu1 }
 0x5eb   : > { %v2867_v32 = vpop.f32.mrb[50].mxu1 }
 0x5ec   : > { %2881 = vrot.lane.b32.xlu1 %v2871_v30, %s4113_s21  ;;  %v3497_v34 = vpop.f32.mrb[51].mxu1 }
 0x63e   : > { %v2874_v9 = vpop.permute.xlu1 %2873 }
 0x63f   : > { %v2884_v39 = vsel %vm2206_vm1, %v2313_v38, %v2874_v9 }
 0x640   : > { %2887 = vst [vmem:[%s257_s14] sm:$0xff] %v2884_v39 }
 0x64e   : > { %v2878_v44 = vpop.permute.xlu0 %2877 }
 0x64f   : > { %v2885_v45 = vsel %vm2206_vm1, %v2535_v43, %v2878_v44 }
 0x650   : > { %2888 = vst [vmem:[%s257_s14 + $0x8] sm:$0xff] %v2885_v45 }
 0x65e   : > { %v2882_v46 = vpop.permute.xlu1 %2881 }
 0x65f   : > { %v2886_v47 = vsel %vm2206_vm1, %v2757_v60, %v2882_v46 }
 0x660   : > { %2889 = vst [vmem:[%s257_s14 + $0x10] sm:$0xff] %v2886_v47 }
 0x661   : > { %4041 = shalt.err (!%p4038_p4)
}
 0x662   : > { %s4042_s29 = scalar_lea.hbm %s4558_s25, 384  ;;  %s4046_s28 = scalar_lea.hbm %s4607_s4, 768 }
 0x663   : > { %p4043_p0 = scmp.ne.s32.totalorder %s4558_s25, %s4042_s29  ;;  %p4047_p8 = scmp.lt.u32.totalorder %s4558_s25, %s4607_s4 }
 0x664   : > { %p4048_p13 = scmp.lt.u32.totalorder %s4046_s28, %s4042_s29  ;;  %p4050_p10 = scmp.lt.u32.totalorder %s4042_s29, %s4558_s25 }
 0x665   : > { %p4044_p9 = pnand %p4043_p0, %p4294_p5 }
 0x666   : > { %p4049_p6 = por %p4048_p13, %p4047_p8 }
 0x667   : > { %p4045_p11 = pneg %p4044_p9 }
 0x668   : > { %p4051_p3 = por %p4050_p10, %p4049_p6 }
 0x66a   : > { %p4052_p7 = pnand %p4051_p3, %p4045_p11 }
 0x66c   : > { %4055 = shalt.err (!%p4052_p7)
}
 0x66d   : > { %3529 = dma.vmem_to_hbm [thread:$0]  (%p4294_p5), %s4560_s7, 384, %s4558_s25, %s2891_s27  }
 0x66e PF: > { %s2917_s23 = sand.u32 1, %s4090_s15   ;;  %p4627_p12 = scmp.ne.s32.totalorder %s4612_s22, 0 }
 0x66f   : > { %p4628_p1 = scmp.ge.s32.totalorder %s4102_s18, 2  ;;  %s2918_s14 = scalar_lea.sflag [#allocation4], %s2917_s23 }
 0x671   : > { %p3546_p2 = pnand %p4628_p1, %p4627_p12 }
 0x673   : > { %4085 = dma.done.wait (!%p3546_p2), %s2918_s14, 384  }
 0x674   : > { %4087 = vsyncadd (!%p3546_p2), %s2918_s14, 4294966912  ;;  %p19_p4 = scmp.ge.s32.totalorder %s4280_s10, 4   ;;  %s4629_s15 = smov %s4094_s16 }
 0x675   : > { %s4630_s16 = smov %s4098_s17  ;;  %s4631_s17 = smov %s4290_s12 }
 0x676   : > { %s4632_s18 = smov %s4280_s10  ;;  %21 = sbr.rel (!%p19_p4) target bundleno = 7 (0x7), region = 93 }
 0x67d   :  { %2923 = vsyncpa [#allocation3], 1 }
 0x67e   :  { %2925 = vsyncpa [#allocation3 + $0x1], 1 }
 0x67f   :  { %2926 = vsyncpa [#allocation6], 1 }
 0x680   :  { %2927 = vsyncpa [#allocation9], 1 }
 0x681   :  { %2928 = vsyncpa [#allocation4], 1 }
 0x682   :  { %2930 = vsyncpa [#allocation4 + $0x1], 1 }

</bundles_post_ra>
